<compile_context>
chip_gen: v7x
topology: tpu7x:2x2x1
jax: 0.10.0
libtpu: 0.0.40
codegen_flags: <defaults>
</compile_context>

<pallas_src>
import functools

import jax
import jax.numpy as jnp
import numpy as np
from jax.experimental import pallas as pl
from jax.experimental.pallas import tpu as pltpu

EPS = 1e-6
NEG_BIG = 1e9


# ----------------------------- in-kernel math ------------------------------ #
def _layernorm(x, g, b):
    """Annotated-Transformer LayerNorm: unbiased std, (x-mean)/(std+eps)."""
    d = x.shape[-1]
    mean = jnp.mean(x, axis=-1, keepdims=True)
    var_unbiased = jnp.sum((x - mean) ** 2, axis=-1, keepdims=True) / (d - 1)
    std = jnp.sqrt(var_unbiased)
    return g * (x - mean) / (std + EPS) + b


def fused_encoder_kernel(x_ref, bias_ref,
                         ln1g_ref, ln1b_ref,
                         wq_ref, bq_ref, wk_ref, bk_ref,
                         wv_ref, bv_ref, wo_ref, bo_ref,
                         ln2g_ref, ln2b_ref,
                         w1_ref, b1_ref, w2_ref, b2_ref,
                         fg_ref, fb_ref,
                         o_ref, x_scr,
                         *, batch_tile, seq, num_heads):
    l = pl.program_id(1)                     # layer index (inner, "arbitrary")
    BT, S, H = batch_tile, seq, num_heads
    R, D = x_scr.shape                       # R = BT * S
    dk = D // H
    scale = 1.0 / float(np.sqrt(dk))

    # Load this batch tile's activations into the resident VMEM carry (layer 0).
    @pl.when(l == 0)
    def _():
        x_scr[...] = x_ref[...].astype(jnp.float32).reshape(R, D)

    x = x_scr[...]                           # (R, D) float32, layer carry

    # ---- sublayer 0: x + SelfAttn(LayerNorm(x), mask) ----
    xn = _layernorm(x, ln1g_ref[...], ln1b_ref[...])
    xnh = jnp.broadcast_to(xn[None], (H, R, D))      # hoisted once, reused 3x

    # head-major projections: (H, R, D) @ (H, D, dk) -> (H, R, dk)
    qh = (jnp.einsum('hrd,hde->hre', xnh, wq_ref[...],
                     preferred_element_type=jnp.float32) + bq_ref[...]) * scale
    kh = jnp.einsum('hrd,hde->hre', xnh, wk_ref[...],
                    preferred_element_type=jnp.float32) + bk_ref[...]
    vh = jnp.einsum('hrd,hde->hre', xnh, wv_ref[...],
                    preferred_element_type=jnp.float32) + bv_ref[...]

    # fold (head, batch-tile) into one leading batch axis: (H*BT, S, dk)
    qh = qh.reshape(H * BT, S, dk)
    kh = kh.reshape(H * BT, S, dk)
    vh = vh.reshape(H * BT, S, dk)

    # additive mask bias (0 attend / -1e9 masked), broadcast to heads in-kernel
    bias = bias_ref[...]                                      # (BT, 1, S)
    bias = jnp.broadcast_to(bias[None], (H,) + bias.shape).reshape(H * BT, 1, S)

    # one batched QK^T / mask / softmax / PV over all heads of this batch tile
    scores = jnp.einsum('bqd,bkd->bqk', qh, kh,
                        preferred_element_type=jnp.float32) + bias
    scores = scores - jnp.max(scores, axis=-1, keepdims=True)
    p = jnp.exp(scores)
    p = p * pl.reciprocal(jnp.sum(p, axis=-1, keepdims=True), approx=True)
    ctx = jnp.einsum('bqk,bkd->bqd', p, vh,
                     preferred_element_type=jnp.float32)      # (H*BT, S, dk)

    # output projection: per-head (R, dk) @ (dk, D), then sum over heads
    ctx = ctx.reshape(H, R, dk)
    attn_h = jnp.einsum('hrd,hde->hre', ctx, wo_ref[...],
                        preferred_element_type=jnp.float32)   # (H, R, D)
    attn = jnp.sum(attn_h, axis=0) + bo_ref[...]
    x = x + attn                             # dropout = identity (eval)

    # ---- sublayer 1: x + FFN(LayerNorm(x)) ----
    xn2 = _layernorm(x, ln2g_ref[...], ln2b_ref[...])
    h1 = jnp.maximum(
        jnp.dot(xn2, w1_ref[...], preferred_element_type=jnp.float32)
        + b1_ref[...], 0.0)
    ff = jnp.dot(h1, w2_ref[...], preferred_element_type=jnp.float32) + b2_ref[...]
    x = x + ff

    x_scr[...] = x                           # carry to next layer (stays in VMEM)

    # final LayerNorm + single HBM writeback on the last layer
    @pl.when(l == pl.num_programs(1) - 1)
    def _():
        o_ref[...] = _layernorm(x, fg_ref[...], fb_ref[...]).reshape(BT, S, D)


# ------------------------------ Pallas wrapper ------------------------------ #
def encoder_forward(x, mask, layer_params, final_g, final_b, num_heads,
                    batch_tile=1):
    """Encoder.forward: pass x (and mask) through each layer, then final norm."""
    B, S, D = x.shape
    N = len(layer_params)
    H = num_heads
    dk = D // H
    BT = batch_tile
    assert D % H == 0 and B % BT == 0
    DFF = layer_params[0]['w1'].shape[-1]

    # stack per-layer params along a leading N axis (streamed by the grid)
    stacked = {k: jnp.stack([p[k] for p in layer_params], axis=0)
               for k in layer_params[0]}

    # one-time HBM-side head-major permutations (no in-kernel lane slicing)
    def head_major_w(w):                     # (N, D, D) -> (N, H, D, dk)
        return w.reshape(N, D, H, dk).transpose(0, 2, 1, 3)

    def head_major_b(b):                     # (N, 1, D) -> (N, H, 1, dk)
        return b.reshape(N, 1, H, dk).transpose(0, 2, 1, 3)

    wq_h, wk_h, wv_h = (head_major_w(stacked[k]) for k in ('wq', 'wk', 'wv'))
    bq_h, bk_h, bv_h = (head_major_b(stacked[k]) for k in ('bq', 'bk', 'bv'))
    wo_h = stacked['wo'].reshape(N, H, dk, D)   # wo_h[n, h] == Wo[n][h*dk:(h+1)*dk, :]

    # additive attention-mask bias (0 = attend, -1e9 = masked); NOT replicated
    bias = (mask.astype(jnp.float32) - 1.0) * NEG_BIG            # (B, 1, S)

    inputs = (x, bias,
              stacked['ln1_g'], stacked['ln1_b'],
              wq_h, bq_h, wk_h, bk_h, wv_h, bv_h, wo_h, stacked['bo'],
              stacked['ln2_g'], stacked['ln2_b'],
              stacked['w1'], stacked['b1'], stacked['w2'], stacked['b2'],
              final_g, final_b)

    def batch_spec(shape):     # leading dim = batch, one tile per outer step
        nd = len(shape)
        return pl.BlockSpec((BT,) + tuple(shape[1:]),
                            lambda b, l, _nd=nd: (b,) + (0,) * (_nd - 1))

    def layer_spec(shape):     # leading dim = N (squeezed), one layer per inner step
        nd = len(shape)
        return pl.BlockSpec((None,) + tuple(shape[1:]),
                            lambda b, l, _nd=nd: (l,) + (0,) * (_nd - 1))

    def const_spec(shape):     # same resident block every step
        nd = len(shape)
        return pl.BlockSpec(tuple(shape), lambda b, l, _nd=nd: (0,) * _nd)

    in_specs = [batch_spec(x.shape), batch_spec(bias.shape)]
    in_specs += [layer_spec(a.shape) for a in inputs[2:18]]
    in_specs += [const_spec(final_g.shape), const_spec(final_b.shape)]

    # advisory cost estimate for XLA scheduling of the fused custom call
    BSr = B * S
    flops = N * (3 * 2 * BSr * D * D          # q/k/v projections
                 + 2 * 2 * B * S * S * D      # QK^T + PV
                 + 2 * BSr * D * D            # output projection
                 + 2 * 2 * BSr * D * DFF)     # FFN
    transcendentals = N * H * B * S * S       # softmax exp
    bytes_accessed = int(sum(int(np.prod(a.shape)) * 4 for a in inputs)
                         + BSr * D * 4)
    cost = pl.CostEstimate(flops=flops, transcendentals=transcendentals,
                           bytes_accessed=bytes_accessed)

    # explicit scoped-VMEM budget: double-buffered per-layer weights + headroom
    per_layer_w_bytes = sum(int(np.prod(a.shape[1:])) * 4 for a in inputs[2:18])
    vmem_limit = int(max(32 * 1024 * 1024, 2 * per_layer_w_bytes + (8 << 20)))

    kernel = functools.partial(fused_encoder_kernel,
                               batch_tile=BT, seq=S, num_heads=H)
    return pl.pallas_call(
        kernel,
        out_shape=jax.ShapeDtypeStruct((B, S, D), jnp.float32),
        grid=(B // BT, N),
        in_specs=in_specs,
        out_specs=batch_spec((B, S, D)),
        scratch_shapes=[pltpu.VMEM((BT * S, D), jnp.float32)],
        compiler_params=pltpu.CompilerParams(
            dimension_semantics=("parallel", "arbitrary"),
            vmem_limit_bytes=vmem_limit),
        cost_estimate=cost,
    )(*inputs)


# ------------------------------ pure-JAX reference -------------------------- #
def _ref_layer(x, mask, p, num_heads):
    D = x.shape[-1]
    dk = D // num_heads
    dot = functools.partial(jnp.einsum, precision=jax.lax.Precision.HIGHEST)
    xn = _layernorm(x, p['ln1_g'], p['ln1_b'])
    q = dot('bsd,de->bse', xn, p['wq']) + p['bq']
    k = dot('bsd,de->bse', xn, p['wk']) + p['bk']
    v = dot('bsd,de->bse', xn, p['wv']) + p['bv']
    attn = jnp.zeros_like(x)
    for h in range(num_heads):
        qs, ks, vs = (t[:, :, h * dk:(h + 1) * dk] for t in (q, k, v))
        s = dot('bqd,bkd->bqk', qs, ks) / np.sqrt(dk)
        s = jnp.where(mask == 0.0, -1e9, s)
        pattn = jax.nn.softmax(s, axis=-1)
        ctx = dot('bqk,bkd->bqd', pattn, vs)
        attn = attn + dot('bqd,de->bqe', ctx, p['wo'][h * dk:(h + 1) * dk, :])
    x = x + attn + p['bo']
    xn2 = _layernorm(x, p['ln2_g'], p['ln2_b'])
    h1 = jax.nn.relu(dot('bsd,df->bsf', xn2, p['w1']) + p['b1'])
    return x + dot('bsf,fd->bsd', h1, p['w2']) + p['b2']


def ref_encoder(x, mask, layer_params, fg, fb, num_heads):
    for p in layer_params:
        x = _ref_layer(x, mask, p, num_heads)
    return _layernorm(x, fg, fb)


# ------------------------------ parameter init ------------------------------ #
def init_params(key, n_layers, d_model, d_ff):
    def lin(k, fan_in, shape):
        return jax.random.normal(k, shape, jnp.float32) / jnp.sqrt(fan_in)

    layers = []
    for i in range(n_layers):
        ks = jax.random.split(jax.random.fold_in(key, i), 12)
        layers.append(dict(
            ln1_g=jnp.ones((1, d_model), jnp.float32),
            ln1_b=jnp.zeros((1, d_model), jnp.float32),
            wq=lin(ks[0], d_model, (d_model, d_model)),
            bq=0.01 * jax.random.normal(ks[1], (1, d_model), jnp.float32),
            wk=lin(ks[2], d_model, (d_model, d_model)),
            bk=0.01 * jax.random.normal(ks[3], (1, d_model), jnp.float32),
            wv=lin(ks[4], d_model, (d_model, d_model)),
            bv=0.01 * jax.random.normal(ks[5], (1, d_model), jnp.float32),
            wo=lin(ks[6], d_model, (d_model, d_model)),
            bo=0.01 * jax.random.normal(ks[7], (1, d_model), jnp.float32),
            ln2_g=jnp.ones((1, d_model), jnp.float32),
            ln2_b=jnp.zeros((1, d_model), jnp.float32),
            w1=lin(ks[8], d_model, (d_model, d_ff)),
            b1=0.01 * jax.random.normal(ks[9], (1, d_ff), jnp.float32),
            w2=lin(ks[10], d_ff, (d_ff, d_model)),
            b2=0.01 * jax.random.normal(ks[11], (1, d_model), jnp.float32),
        ))
    final_g = jnp.ones((1, d_model), jnp.float32)
    final_b = jnp.zeros((1, d_model), jnp.float32)
    return layers, final_g, final_b


# ----------------------------------- main ----------------------------------- #
if __name__ == "__main__":
    B, S, D, H, DFF, N = 2, 8, 32, 4, 64, 2

    key = jax.random.PRNGKey(0)
    kx, kp = jax.random.split(key)
    x = jax.random.normal(kx, (B, S, D), jnp.float32)

    # padding mask: batch 0 attends to all 8 positions, batch 1 only to first 5
    lengths = jnp.array([S, S - 3])
    mask = (jnp.arange(S)[None, :] < lengths[:, None]).astype(jnp.float32)
    mask = mask[:, None, :]                                  # (B, 1, S)

    layer_params, final_g, final_b = init_params(kp, N, D, DFF)

    out = encoder_forward(x, mask, layer_params, final_g, final_b, H,
                          batch_tile=1)
    out = jax.block_until_ready(out)

    ref = jax.block_until_ready(
        ref_encoder(x, mask, layer_params, final_g, final_b, H))
    np.testing.assert_allclose(np.asarray(out), np.asarray(ref),
                               rtol=2e-2, atol=2e-2)

    print("KERNEL_OK")
</pallas_src>

<mosaic_0001>
module attributes {stable_mosaic.version = 11 : i64} {
  func.func @fused_encoder_kernel(%arg0: i32, %arg1: i32, %arg2: memref<1x8x32xf32, #tpu.memory_space<vmem>>, %arg3: memref<1x1x8xf32, #tpu.memory_space<vmem>>, %arg4: memref<1x1x32xf32, #tpu.memory_space<vmem>>, %arg5: memref<1x1x32xf32, #tpu.memory_space<vmem>>, %arg6: memref<1x4x32x8xf32, #tpu.memory_space<vmem>>, %arg7: memref<1x4x1x8xf32, #tpu.memory_space<vmem>>, %arg8: memref<1x4x32x8xf32, #tpu.memory_space<vmem>>, %arg9: memref<1x4x1x8xf32, #tpu.memory_space<vmem>>, %arg10: memref<1x4x32x8xf32, #tpu.memory_space<vmem>>, %arg11: memref<1x4x1x8xf32, #tpu.memory_space<vmem>>, %arg12: memref<1x4x8x32xf32, #tpu.memory_space<vmem>>, %arg13: memref<1x1x32xf32, #tpu.memory_space<vmem>>, %arg14: memref<1x1x32xf32, #tpu.memory_space<vmem>>, %arg15: memref<1x1x32xf32, #tpu.memory_space<vmem>>, %arg16: memref<1x32x64xf32, #tpu.memory_space<vmem>>, %arg17: memref<1x1x64xf32, #tpu.memory_space<vmem>>, %arg18: memref<1x64x32xf32, #tpu.memory_space<vmem>>, %arg19: memref<1x1x32xf32, #tpu.memory_space<vmem>>, %arg20: memref<1x32xf32, #tpu.memory_space<vmem>>, %arg21: memref<1x32xf32, #tpu.memory_space<vmem>>, %arg22: memref<1x8x32xf32, #tpu.memory_space<vmem>>, %arg23: memref<8x32xf32, #tpu.memory_space<vmem>>) attributes {dimension_semantics = [#tpu.dimension_semantics<parallel>, #tpu.dimension_semantics<arbitrary>], iteration_bounds = array<i64: 2, 2>, scalar_prefetch = 0 : i64, scratch_operands = 1 : i64, tpu.core_type = #tpu.core_type<tc>, window_params = [{transform_indices = @transform_0, window_bounds = array<i64: 1, 8, 32>}, {transform_indices = @transform_1, window_bounds = array<i64: 1, 1, 8>}, {transform_indices = @transform_2, window_bounds = array<i64: 1, 1, 32>}, {transform_indices = @transform_3, window_bounds = array<i64: 1, 1, 32>}, {transform_indices = @transform_4, window_bounds = array<i64: 1, 4, 32, 8>}, {transform_indices = @transform_5, window_bounds = array<i64: 1, 4, 1, 8>}, {transform_indices = @transform_6, window_bounds = array<i64: 1, 4, 32, 8>}, {transform_indices = @transform_7, window_bounds = array<i64: 1, 4, 1, 8>}, {transform_indices = @transform_8, window_bounds = array<i64: 1, 4, 32, 8>}, {transform_indices = @transform_9, window_bounds = array<i64: 1, 4, 1, 8>}, {transform_indices = @transform_10, window_bounds = array<i64: 1, 4, 8, 32>}, {transform_indices = @transform_11, window_bounds = array<i64: 1, 1, 32>}, {transform_indices = @transform_12, window_bounds = array<i64: 1, 1, 32>}, {transform_indices = @transform_13, window_bounds = array<i64: 1, 1, 32>}, {transform_indices = @transform_14, window_bounds = array<i64: 1, 32, 64>}, {transform_indices = @transform_15, window_bounds = array<i64: 1, 1, 64>}, {transform_indices = @transform_16, window_bounds = array<i64: 1, 64, 32>}, {transform_indices = @transform_17, window_bounds = array<i64: 1, 1, 32>}, {pipeline_mode = #tpu.pipeline_mode<synchronous>, transform_indices = @transform_18, window_bounds = array<i64: 1, 32>}, {pipeline_mode = #tpu.pipeline_mode<synchronous>, transform_indices = @transform_19, window_bounds = array<i64: 1, 32>}, {transform_indices = @transform_20, window_bounds = array<i64: 1, 8, 32>}]} {
    %c0_i32 = arith.constant 0 : i32
    %0 = arith.cmpi eq, %arg1, %c0_i32 : i32
    %1 = arith.extui %0 : i1 to i32
    %c0_i32_0 = arith.constant 0 : i32
    %2 = arith.cmpi ne, %1, %c0_i32_0 : i32
    scf.if %2 {
      %c0_85 = arith.constant 0 : index
      %c0_86 = arith.constant 0 : index
      %c0_87 = arith.constant 0 : index
      %131 = vector.load %arg2[%c0_85, %c0_86, %c0_87] : memref<1x8x32xf32, #tpu.memory_space<vmem>>, vector<1x8x32xf32>
      %132 = vector.shape_cast %131 : vector<1x8x32xf32> to vector<8x32xf32>
      %c0_88 = arith.constant 0 : index
      %c0_89 = arith.constant 0 : index
      %133 = vector.load %arg23[%c0_88, %c0_89] : memref<8x32xf32, #tpu.memory_space<vmem>>, vector<8x32xf32>
      tpu.vector_store %arg23[%c0_88, %c0_89], %132 {strides = array<i32>} : memref<8x32xf32, #tpu.memory_space<vmem>>, vector<8x32xf32>,
    } else {
    }
    %c0 = arith.constant 0 : index
    %c0_1 = arith.constant 0 : index
    %3 = vector.load %arg23[%c0, %c0_1] : memref<8x32xf32, #tpu.memory_space<vmem>>, vector<8x32xf32>
    %c0_2 = arith.constant 0 : index
    %c0_3 = arith.constant 0 : index
    %c0_4 = arith.constant 0 : index
    %4 = vector.load %arg4[%c0_2, %c0_3, %c0_4] : memref<1x1x32xf32, #tpu.memory_space<vmem>>, vector<1x1x32xf32>
    %5 = vector.shape_cast %4 : vector<1x1x32xf32> to vector<1x32xf32>
    %c0_5 = arith.constant 0 : index
    %c0_6 = arith.constant 0 : index
    %c0_7 = arith.constant 0 : index
    %6 = vector.load %arg5[%c0_5, %c0_6, %c0_7] : memref<1x1x32xf32, #tpu.memory_space<vmem>>, vector<1x1x32xf32>
    %7 = vector.shape_cast %6 : vector<1x1x32xf32> to vector<1x32xf32>
    %cst = arith.constant dense<0.000000e+00> : vector<8xf32>
    %8 = vector.multi_reduction <add>, %3, %cst [1] : vector<8x32xf32> to vector<8xf32>
    %9 = vector.shape_cast %8 : vector<8xf32> to vector<8x1xf32>
    %cst_8 = arith.constant 3.200000e+01 : f32
    %10 = vector.broadcast %cst_8 : f32 to vector<8x1xf32>
    %11 = arith.divf %9, %10 : vector<8x1xf32>
    %12 = vector.broadcast %11 : vector<8x1xf32> to vector<8x32xf32>
    %13 = arith.subf %3, %12 : vector<8x32xf32>
    %14 = arith.mulf %13, %13 : vector<8x32xf32>
    %cst_9 = arith.constant dense<0.000000e+00> : vector<8xf32>
    %15 = vector.multi_reduction <add>, %14, %cst_9 [1] : vector<8x32xf32> to vector<8xf32>
    %16 = vector.shape_cast %15 : vector<8xf32> to vector<8x1xf32>
    %cst_10 = arith.constant 3.100000e+01 : f32
    %17 = vector.broadcast %cst_10 : f32 to vector<8x1xf32>
    %18 = arith.divf %16, %17 : vector<8x1xf32>
    %19 = math.sqrt %18 : vector<8x1xf32>
    %20 = vector.broadcast %11 : vector<8x1xf32> to vector<8x32xf32>
    %21 = arith.subf %3, %20 : vector<8x32xf32>
    %22 = vector.broadcast %5 : vector<1x32xf32> to vector<8x32xf32>
    %23 = arith.mulf %22, %21 : vector<8x32xf32>
    %cst_11 = arith.constant 9.99999997E-7 : f32
    %24 = vector.broadcast %cst_11 : f32 to vector<8x1xf32>
    %25 = arith.addf %19, %24 : vector<8x1xf32>
    %26 = vector.broadcast %25 : vector<8x1xf32> to vector<8x32xf32>
    %27 = arith.divf %23, %26 : vector<8x32xf32>
    %28 = vector.broadcast %7 : vector<1x32xf32> to vector<8x32xf32>
    %29 = arith.addf %27, %28 : vector<8x32xf32>
    %30 = vector.shape_cast %29 : vector<8x32xf32> to vector<1x8x32xf32>
    %31 = vector.shape_cast %30 : vector<1x8x32xf32> to vector<1x8x32xf32>
    %32 = vector.broadcast %31 : vector<1x8x32xf32> to vector<4x8x32xf32>
    %c0_12 = arith.constant 0 : index
    %c0_13 = arith.constant 0 : index
    %c0_14 = arith.constant 0 : index
    %c0_15 = arith.constant 0 : index
    %33 = vector.load %arg6[%c0_12, %c0_13, %c0_14, %c0_15] : memref<1x4x32x8xf32, #tpu.memory_space<vmem>>, vector<1x4x32x8xf32>
    %34 = vector.shape_cast %33 : vector<1x4x32x8xf32> to vector<4x32x8xf32>
    "tpu.trace_start"() <{level = 10 : i32, message = "hrd,hde->hre"}> : () -> ()
    %cst_16 = arith.constant dense<0.000000e+00> : vector<4x8x8xf32>
    %35 = tpu.matmul %32, %34, %cst_16 {dimension_numbers = #tpu.dot_dimension_numbers<[2], [1], [1], [2], [0, 0, 0, 1, 1, 2], [0], [0]>} : vector<4x8x32xf32>, vector<4x32x8xf32>, vector<4x8x8xf32> -> vector<4x8x8xf32>
    "tpu.trace_stop"() : () -> ()
    %c0_17 = arith.constant 0 : index
    %c0_18 = arith.constant 0 : index
    %c0_19 = arith.constant 0 : index
    %c0_20 = arith.constant 0 : index
    %36 = vector.load %arg7[%c0_17, %c0_18, %c0_19, %c0_20] : memref<1x4x1x8xf32, #tpu.memory_space<vmem>>, vector<1x4x1x8xf32>
    %37 = vector.shape_cast %36 : vector<1x4x1x8xf32> to vector<4x1x8xf32>
    %38 = vector.broadcast %37 : vector<4x1x8xf32> to vector<4x8x8xf32>
    %39 = arith.addf %35, %38 : vector<4x8x8xf32>
    %cst_21 = arith.constant 0.353553385 : f32
    %40 = vector.broadcast %cst_21 : f32 to vector<4x8x8xf32>
    %41 = arith.mulf %39, %40 : vector<4x8x8xf32>
    %c0_22 = arith.constant 0 : index
    %c0_23 = arith.constant 0 : index
    %c0_24 = arith.constant 0 : index
    %c0_25 = arith.constant 0 : index
    %42 = vector.load %arg8[%c0_22, %c0_23, %c0_24, %c0_25] : memref<1x4x32x8xf32, #tpu.memory_space<vmem>>, vector<1x4x32x8xf32>
    %43 = vector.shape_cast %42 : vector<1x4x32x8xf32> to vector<4x32x8xf32>
    "tpu.trace_start"() <{level = 10 : i32, message = "hrd,hde->hre"}> : () -> ()
    %cst_26 = arith.constant dense<0.000000e+00> : vector<4x8x8xf32>
    %44 = tpu.matmul %32, %43, %cst_26 {dimension_numbers = #tpu.dot_dimension_numbers<[2], [1], [1], [2], [0, 0, 0, 1, 1, 2], [0], [0]>} : vector<4x8x32xf32>, vector<4x32x8xf32>, vector<4x8x8xf32> -> vector<4x8x8xf32>
    "tpu.trace_stop"() : () -> ()
    %c0_27 = arith.constant 0 : index
    %c0_28 = arith.constant 0 : index
    %c0_29 = arith.constant 0 : index
    %c0_30 = arith.constant 0 : index
    %45 = vector.load %arg9[%c0_27, %c0_28, %c0_29, %c0_30] : memref<1x4x1x8xf32, #tpu.memory_space<vmem>>, vector<1x4x1x8xf32>
    %46 = vector.shape_cast %45 : vector<1x4x1x8xf32> to vector<4x1x8xf32>
    %47 = vector.broadcast %46 : vector<4x1x8xf32> to vector<4x8x8xf32>
    %48 = arith.addf %44, %47 : vector<4x8x8xf32>
    %c0_31 = arith.constant 0 : index
    %c0_32 = arith.constant 0 : index
    %c0_33 = arith.constant 0 : index
    %c0_34 = arith.constant 0 : index
    %49 = vector.load %arg10[%c0_31, %c0_32, %c0_33, %c0_34] : memref<1x4x32x8xf32, #tpu.memory_space<vmem>>, vector<1x4x32x8xf32>
    %50 = vector.shape_cast %49 : vector<1x4x32x8xf32> to vector<4x32x8xf32>
    "tpu.trace_start"() <{level = 10 : i32, message = "hrd,hde->hre"}> : () -> ()
    %cst_35 = arith.constant dense<0.000000e+00> : vector<4x8x8xf32>
    %51 = tpu.matmul %32, %50, %cst_35 {dimension_numbers = #tpu.dot_dimension_numbers<[2], [1], [1], [2], [0, 0, 0, 1, 1, 2], [0], [0]>} : vector<4x8x32xf32>, vector<4x32x8xf32>, vector<4x8x8xf32> -> vector<4x8x8xf32>
    "tpu.trace_stop"() : () -> ()
    %c0_36 = arith.constant 0 : index
    %c0_37 = arith.constant 0 : index
    %c0_38 = arith.constant 0 : index
    %c0_39 = arith.constant 0 : index
    %52 = vector.load %arg11[%c0_36, %c0_37, %c0_38, %c0_39] : memref<1x4x1x8xf32, #tpu.memory_space<vmem>>, vector<1x4x1x8xf32>
    %53 = vector.shape_cast %52 : vector<1x4x1x8xf32> to vector<4x1x8xf32>
    %54 = vector.broadcast %53 : vector<4x1x8xf32> to vector<4x8x8xf32>
    %55 = arith.addf %51, %54 : vector<4x8x8xf32>
    %c0_40 = arith.constant 0 : index
    %c0_41 = arith.constant 0 : index
    %c0_42 = arith.constant 0 : index
    %56 = vector.load %arg3[%c0_40, %c0_41, %c0_42] : memref<1x1x8xf32, #tpu.memory_space<vmem>>, vector<1x1x8xf32>
    %57 = vector.shape_cast %56 : vector<1x1x8xf32> to vector<1x1x1x8xf32>
    %58 = vector.shape_cast %57 : vector<1x1x1x8xf32> to vector<1x1x1x8xf32>
    %59 = vector.broadcast %58 : vector<1x1x1x8xf32> to vector<4x1x1x8xf32>
    %60 = vector.shape_cast %59 : vector<4x1x1x8xf32> to vector<4x1x8xf32>
    "tpu.trace_start"() <{level = 10 : i32, message = "bqd,bkd->bqk"}> : () -> ()
    %cst_43 = arith.constant dense<0.000000e+00> : vector<4x8x8xf32>
    %61 = tpu.matmul %41, %48, %cst_43 {dimension_numbers = #tpu.dot_dimension_numbers<[2], [2], [1], [1], [0, 0, 0, 1, 1, 1], [0], [0]>} : vector<4x8x8xf32>, vector<4x8x8xf32>, vector<4x8x8xf32> -> vector<4x8x8xf32>
    "tpu.trace_stop"() : () -> ()
    %62 = vector.broadcast %60 : vector<4x1x8xf32> to vector<4x8x8xf32>
    %63 = arith.addf %61, %62 : vector<4x8x8xf32>
    %cst_44 = arith.constant dense<0xFF800000> : vector<4x8xf32>
    %64 = vector.multi_reduction <maximumf>, %63, %cst_44 [2] : vector<4x8x8xf32> to vector<4x8xf32>
    %65 = vector.shape_cast %64 : vector<4x8xf32> to vector<4x8x1xf32>
    %66 = vector.broadcast %65 : vector<4x8x1xf32> to vector<4x8x8xf32>
    %67 = arith.subf %63, %66 : vector<4x8x8xf32>
    %68 = math.exp %67 : vector<4x8x8xf32>
    %cst_45 = arith.constant dense<0.000000e+00> : vector<4x8xf32>
    %69 = vector.multi_reduction <add>, %68, %cst_45 [2] : vector<4x8x8xf32> to vector<4x8xf32>
    %70 = vector.shape_cast %69 : vector<4x8xf32> to vector<4x8x1xf32>
    %71 = tpu.reciprocal %70 {approx = true} : vector<4x8x1xf32> -> vector<4x8x1xf32>
    %72 = vector.broadcast %71 : vector<4x8x1xf32> to vector<4x8x8xf32>
    %73 = arith.mulf %68, %72 : vector<4x8x8xf32>
    "tpu.trace_start"() <{level = 10 : i32, message = "bqk,bkd->bqd"}> : () -> ()
    %cst_46 = arith.constant dense<0.000000e+00> : vector<4x8x8xf32>
    %74 = tpu.matmul %73, %55, %cst_46 {dimension_numbers = #tpu.dot_dimension_numbers<[2], [1], [1], [2], [0, 0, 0, 1, 1, 2], [0], [0]>} : vector<4x8x8xf32>, vector<4x8x8xf32>, vector<4x8x8xf32> -> vector<4x8x8xf32>
    "tpu.trace_stop"() : () -> ()
    %c0_47 = arith.constant 0 : index
    %c0_48 = arith.constant 0 : index
    %c0_49 = arith.constant 0 : index
    %c0_50 = arith.constant 0 : index
    %75 = vector.load %arg12[%c0_47, %c0_48, %c0_49, %c0_50] : memref<1x4x8x32xf32, #tpu.memory_space<vmem>>, vector<1x4x8x32xf32>
    %76 = vector.shape_cast %75 : vector<1x4x8x32xf32> to vector<4x8x32xf32>
    "tpu.trace_start"() <{level = 10 : i32, message = "hrd,hde->hre"}> : () -> ()
    %cst_51 = arith.constant dense<0.000000e+00> : vector<4x8x32xf32>
    %77 = tpu.matmul %74, %76, %cst_51 {dimension_numbers = #tpu.dot_dimension_numbers<[2], [1], [1], [2], [0, 0, 0, 1, 1, 2], [0], [0]>} : vector<4x8x8xf32>, vector<4x8x32xf32>, vector<4x8x32xf32> -> vector<4x8x32xf32>
    "tpu.trace_stop"() : () -> ()
    %cst_52 = arith.constant dense<0.000000e+00> : vector<8x32xf32>
    %78 = vector.multi_reduction <add>, %77, %cst_52 [0] : vector<4x8x32xf32> to vector<8x32xf32>
    %c0_53 = arith.constant 0 : index
    %c0_54 = arith.constant 0 : index
    %c0_55 = arith.constant 0 : index
    %79 = vector.load %arg13[%c0_53, %c0_54, %c0_55] : memref<1x1x32xf32, #tpu.memory_space<vmem>>, vector<1x1x32xf32>
    %80 = vector.shape_cast %79 : vector<1x1x32xf32> to vector<1x32xf32>
    %81 = vector.broadcast %80 : vector<1x32xf32> to vector<8x32xf32>
    %82 = arith.addf %78, %81 : vector<8x32xf32>
    %83 = arith.addf %3, %82 : vector<8x32xf32>
    %c0_56 = arith.constant 0 : index
    %c0_57 = arith.constant 0 : index
    %c0_58 = arith.constant 0 : index
    %84 = vector.load %arg14[%c0_56, %c0_57, %c0_58] : memref<1x1x32xf32, #tpu.memory_space<vmem>>, vector<1x1x32xf32>
    %85 = vector.shape_cast %84 : vector<1x1x32xf32> to vector<1x32xf32>
    %c0_59 = arith.constant 0 : index
    %c0_60 = arith.constant 0 : index
    %c0_61 = arith.constant 0 : index
    %86 = vector.load %arg15[%c0_59, %c0_60, %c0_61] : memref<1x1x32xf32, #tpu.memory_space<vmem>>, vector<1x1x32xf32>
    %87 = vector.shape_cast %86 : vector<1x1x32xf32> to vector<1x32xf32>
    %cst_62 = arith.constant dense<0.000000e+00> : vector<8xf32>
    %88 = vector.multi_reduction <add>, %83, %cst_62 [1] : vector<8x32xf32> to vector<8xf32>
    %89 = vector.shape_cast %88 : vector<8xf32> to vector<8x1xf32>
    %cst_63 = arith.constant 3.200000e+01 : f32
    %90 = vector.broadcast %cst_63 : f32 to vector<8x1xf32>
    %91 = arith.divf %89, %90 : vector<8x1xf32>
    %92 = vector.broadcast %91 : vector<8x1xf32> to vector<8x32xf32>
    %93 = arith.subf %83, %92 : vector<8x32xf32>
    %94 = arith.mulf %93, %93 : vector<8x32xf32>
    %cst_64 = arith.constant dense<0.000000e+00> : vector<8xf32>
    %95 = vector.multi_reduction <add>, %94, %cst_64 [1] : vector<8x32xf32> to vector<8xf32>
    %96 = vector.shape_cast %95 : vector<8xf32> to vector<8x1xf32>
    %cst_65 = arith.constant 3.100000e+01 : f32
    %97 = vector.broadcast %cst_65 : f32 to vector<8x1xf32>
    %98 = arith.divf %96, %97 : vector<8x1xf32>
    %99 = math.sqrt %98 : vector<8x1xf32>
    %100 = vector.broadcast %91 : vector<8x1xf32> to vector<8x32xf32>
    %101 = arith.subf %83, %100 : vector<8x32xf32>
    %102 = vector.broadcast %85 : vector<1x32xf32> to vector<8x32xf32>
    %103 = arith.mulf %102, %101 : vector<8x32xf32>
    %cst_66 = arith.constant 9.99999997E-7 : f32
    %104 = vector.broadcast %cst_66 : f32 to vector<8x1xf32>
    %105 = arith.addf %99, %104 : vector<8x1xf32>
    %106 = vector.broadcast %105 : vector<8x1xf32> to vector<8x32xf32>
    %107 = arith.divf %103, %106 : vector<8x32xf32>
    %108 = vector.broadcast %87 : vector<1x32xf32> to vector<8x32xf32>
    %109 = arith.addf %107, %108 : vector<8x32xf32>
    %c0_67 = arith.constant 0 : index
    %c0_68 = arith.constant 0 : index
    %c0_69 = arith.constant 0 : index
    %110 = vector.load %arg16[%c0_67, %c0_68, %c0_69] : memref<1x32x64xf32, #tpu.memory_space<vmem>>, vector<1x32x64xf32>
    %111 = vector.shape_cast %110 : vector<1x32x64xf32> to vector<32x64xf32>
    %cst_70 = arith.constant dense<0.000000e+00> : vector<8x64xf32>
    %112 = tpu.matmul %109, %111, %cst_70 {dimension_numbers = #tpu.dot_dimension_numbers<[1], [0], [0], [1], [0, 0, 1, 1], [], []>} : vector<8x32xf32>, vector<32x64xf32>, vector<8x64xf32> -> vector<8x64xf32>
    %c0_71 = arith.constant 0 : index
    %c0_72 = arith.constant 0 : index
    %c0_73 = arith.constant 0 : index
    %113 = vector.load %arg17[%c0_71, %c0_72, %c0_73] : memref<1x1x64xf32, #tpu.memory_space<vmem>>, vector<1x1x64xf32>
    %114 = vector.shape_cast %113 : vector<1x1x64xf32> to vector<1x64xf32>
    %115 = vector.broadcast %114 : vector<1x64xf32> to vector<8x64xf32>
    %116 = arith.addf %112, %115 : vector<8x64xf32>
    %cst_74 = arith.constant 0.000000e+00 : f32
    %117 = vector.broadcast %cst_74 : f32 to vector<8x64xf32>
    %118 = arith.maximumf %116, %117 : vector<8x64xf32>
    %c0_75 = arith.constant 0 : index
    %c0_76 = arith.constant 0 : index
    %c0_77 = arith.constant 0 : index
    %119 = vector.load %arg18[%c0_75, %c0_76, %c0_77] : memref<1x64x32xf32, #tpu.memory_space<vmem>>, vector<1x64x32xf32>
    %120 = vector.shape_cast %119 : vector<1x64x32xf32> to vector<64x32xf32>
    %cst_78 = arith.constant dense<0.000000e+00> : vector<8x32xf32>
    %121 = tpu.matmul %118, %120, %cst_78 {dimension_numbers = #tpu.dot_dimension_numbers<[1], [0], [0], [1], [0, 0, 1, 1], [], []>} : vector<8x64xf32>, vector<64x32xf32>, vector<8x32xf32> -> vector<8x32xf32>
    %c0_79 = arith.constant 0 : index
    %c0_80 = arith.constant 0 : index
    %c0_81 = arith.constant 0 : index
    %122 = vector.load %arg19[%c0_79, %c0_80, %c0_81] : memref<1x1x32xf32, #tpu.memory_space<vmem>>, vector<1x1x32xf32>
    %123 = vector.shape_cast %122 : vector<1x1x32xf32> to vector<1x32xf32>
    %124 = vector.broadcast %123 : vector<1x32xf32> to vector<8x32xf32>
    %125 = arith.addf %121, %124 : vector<8x32xf32>
    %126 = arith.addf %83, %125 : vector<8x32xf32>
    %c0_82 = arith.constant 0 : index
    %c0_83 = arith.constant 0 : index
    %127 = vector.load %arg23[%c0_82, %c0_83] : memref<8x32xf32, #tpu.memory_space<vmem>>, vector<8x32xf32>
    tpu.vector_store %arg23[%c0_82, %c0_83], %126 {strides = array<i32>} : memref<8x32xf32, #tpu.memory_space<vmem>>, vector<8x32xf32>,
    %c1_i32 = arith.constant 1 : i32
    %128 = arith.cmpi eq, %arg1, %c1_i32 : i32
    %129 = arith.extui %128 : i1 to i32
    %c0_i32_84 = arith.constant 0 : i32
    %130 = arith.cmpi ne, %129, %c0_i32_84 : i32
    scf.if %130 {
      %c0_85 = arith.constant 0 : index
      %c0_86 = arith.constant 0 : index
      %131 = vector.load %arg20[%c0_85, %c0_86] : memref<1x32xf32, #tpu.memory_space<vmem>>, vector<1x32xf32>
      %c0_87 = arith.constant 0 : index
      %c0_88 = arith.constant 0 : index
      %132 = vector.load %arg21[%c0_87, %c0_88] : memref<1x32xf32, #tpu.memory_space<vmem>>, vector<1x32xf32>
      %cst_89 = arith.constant dense<0.000000e+00> : vector<8xf32>
      %133 = vector.multi_reduction <add>, %126, %cst_89 [1] : vector<8x32xf32> to vector<8xf32>
      %134 = vector.shape_cast %133 : vector<8xf32> to vector<8x1xf32>
      %cst_90 = arith.constant 3.200000e+01 : f32
      %135 = vector.broadcast %cst_90 : f32 to vector<8x1xf32>
      %136 = arith.divf %134, %135 : vector<8x1xf32>
      %137 = vector.broadcast %136 : vector<8x1xf32> to vector<8x32xf32>
      %138 = arith.subf %126, %137 : vector<8x32xf32>
      %139 = arith.mulf %138, %138 : vector<8x32xf32>
      %cst_91 = arith.constant dense<0.000000e+00> : vector<8xf32>
      %140 = vector.multi_reduction <add>, %139, %cst_91 [1] : vector<8x32xf32> to vector<8xf32>
      %141 = vector.shape_cast %140 : vector<8xf32> to vector<8x1xf32>
      %cst_92 = arith.constant 3.100000e+01 : f32
      %142 = vector.broadcast %cst_92 : f32 to vector<8x1xf32>
      %143 = arith.divf %141, %142 : vector<8x1xf32>
      %144 = math.sqrt %143 : vector<8x1xf32>
      %145 = vector.broadcast %136 : vector<8x1xf32> to vector<8x32xf32>
      %146 = arith.subf %126, %145 : vector<8x32xf32>
      %147 = vector.broadcast %131 : vector<1x32xf32> to vector<8x32xf32>
      %148 = arith.mulf %147, %146 : vector<8x32xf32>
      %cst_93 = arith.constant 9.99999997E-7 : f32
      %149 = vector.broadcast %cst_93 : f32 to vector<8x1xf32>
      %150 = arith.addf %144, %149 : vector<8x1xf32>
      %151 = vector.broadcast %150 : vector<8x1xf32> to vector<8x32xf32>
      %152 = arith.divf %148, %151 : vector<8x32xf32>
      %153 = vector.broadcast %132 : vector<1x32xf32> to vector<8x32xf32>
      %154 = arith.addf %152, %153 : vector<8x32xf32>
      %155 = vector.shape_cast %154 : vector<8x32xf32> to vector<1x8x32xf32>
      %c0_94 = arith.constant 0 : index
      %c0_95 = arith.constant 0 : index
      %c0_96 = arith.constant 0 : index
      %156 = vector.load %arg22[%c0_94, %c0_95, %c0_96] : memref<1x8x32xf32, #tpu.memory_space<vmem>>, vector<1x8x32xf32>
      tpu.vector_store %arg22[%c0_94, %c0_95, %c0_96], %155 {strides = array<i32>} : memref<1x8x32xf32, #tpu.memory_space<vmem>>, vector<1x8x32xf32>,
    } else {
    }
    return
  }
  func.func @transform_0(%arg0: i32, %arg1: i32) -> (i32, i32, i32) {
    %c0_i32 = arith.constant 0 : i32
    %c0_i32_0 = arith.constant 0 : i32
    %c0_i32_1 = arith.constant 0 : i32
    return %arg0, %c0_i32, %c0_i32_0 : i32, i32, i32
  }
  func.func @transform_1(%arg0: i32, %arg1: i32) -> (i32, i32, i32) {
    %c0_i32 = arith.constant 0 : i32
    %c0_i32_0 = arith.constant 0 : i32
    %c0_i32_1 = arith.constant 0 : i32
    return %arg0, %c0_i32, %c0_i32_0 : i32, i32, i32
  }
  func.func @transform_2(%arg0: i32, %arg1: i32) -> (i32, i32, i32) {
    %c0_i32 = arith.constant 0 : i32
    %c0_i32_0 = arith.constant 0 : i32
    %c0_i32_1 = arith.constant 0 : i32
    return %arg1, %c0_i32, %c0_i32_0 : i32, i32, i32
  }
  func.func @transform_3(%arg0: i32, %arg1: i32) -> (i32, i32, i32) {
    %c0_i32 = arith.constant 0 : i32
    %c0_i32_0 = arith.constant 0 : i32
    %c0_i32_1 = arith.constant 0 : i32
    return %arg1, %c0_i32, %c0_i32_0 : i32, i32, i32
  }
  func.func @transform_4(%arg0: i32, %arg1: i32) -> (i32, i32, i32, i32) {
    %c0_i32 = arith.constant 0 : i32
    %c0_i32_0 = arith.constant 0 : i32
    %c0_i32_1 = arith.constant 0 : i32
    %c0_i32_2 = arith.constant 0 : i32
    return %arg1, %c0_i32, %c0_i32_0, %c0_i32_1 : i32, i32, i32, i32
  }
  func.func @transform_5(%arg0: i32, %arg1: i32) -> (i32, i32, i32, i32) {
    %c0_i32 = arith.constant 0 : i32
    %c0_i32_0 = arith.constant 0 : i32
    %c0_i32_1 = arith.constant 0 : i32
    %c0_i32_2 = arith.constant 0 : i32
    return %arg1, %c0_i32, %c0_i32_0, %c0_i32_1 : i32, i32, i32, i32
  }
  func.func @transform_6(%arg0: i32, %arg1: i32) -> (i32, i32, i32, i32) {
    %c0_i32 = arith.constant 0 : i32
    %c0_i32_0 = arith.constant 0 : i32
    %c0_i32_1 = arith.constant 0 : i32
    %c0_i32_2 = arith.constant 0 : i32
    return %arg1, %c0_i32, %c0_i32_0, %c0_i32_1 : i32, i32, i32, i32
  }
  func.func @transform_7(%arg0: i32, %arg1: i32) -> (i32, i32, i32, i32) {
    %c0_i32 = arith.constant 0 : i32
    %c0_i32_0 = arith.constant 0 : i32
    %c0_i32_1 = arith.constant 0 : i32
    %c0_i32_2 = arith.constant 0 : i32
    return %arg1, %c0_i32, %c0_i32_0, %c0_i32_1 : i32, i32, i32, i32
  }
  func.func @transform_8(%arg0: i32, %arg1: i32) -> (i32, i32, i32, i32) {
    %c0_i32 = arith.constant 0 : i32
    %c0_i32_0 = arith.constant 0 : i32
    %c0_i32_1 = arith.constant 0 : i32
    %c0_i32_2 = arith.constant 0 : i32
    return %arg1, %c0_i32, %c0_i32_0, %c0_i32_1 : i32, i32, i32, i32
  }
  func.func @transform_9(%arg0: i32, %arg1: i32) -> (i32, i32, i32, i32) {
    %c0_i32 = arith.constant 0 : i32
    %c0_i32_0 = arith.constant 0 : i32
    %c0_i32_1 = arith.constant 0 : i32
    %c0_i32_2 = arith.constant 0 : i32
    return %arg1, %c0_i32, %c0_i32_0, %c0_i32_1 : i32, i32, i32, i32
  }
  func.func @transform_10(%arg0: i32, %arg1: i32) -> (i32, i32, i32, i32) {
    %c0_i32 = arith.constant 0 : i32
    %c0_i32_0 = arith.constant 0 : i32
    %c0_i32_1 = arith.constant 0 : i32
    %c0_i32_2 = arith.constant 0 : i32
    return %arg1, %c0_i32, %c0_i32_0, %c0_i32_1 : i32, i32, i32, i32
  }
  func.func @transform_11(%arg0: i32, %arg1: i32) -> (i32, i32, i32) {
    %c0_i32 = arith.constant 0 : i32
    %c0_i32_0 = arith.constant 0 : i32
    %c0_i32_1 = arith.constant 0 : i32
    return %arg1, %c0_i32, %c0_i32_0 : i32, i32, i32
  }
  func.func @transform_12(%arg0: i32, %arg1: i32) -> (i32, i32, i32) {
    %c0_i32 = arith.constant 0 : i32
    %c0_i32_0 = arith.constant 0 : i32
    %c0_i32_1 = arith.constant 0 : i32
    return %arg1, %c0_i32, %c0_i32_0 : i32, i32, i32
  }
  func.func @transform_13(%arg0: i32, %arg1: i32) -> (i32, i32, i32) {
    %c0_i32 = arith.constant 0 : i32
    %c0_i32_0 = arith.constant 0 : i32
    %c0_i32_1 = arith.constant 0 : i32
    return %arg1, %c0_i32, %c0_i32_0 : i32, i32, i32
  }
  func.func @transform_14(%arg0: i32, %arg1: i32) -> (i32, i32, i32) {
    %c0_i32 = arith.constant 0 : i32
    %c0_i32_0 = arith.constant 0 : i32
    %c0_i32_1 = arith.constant 0 : i32
    return %arg1, %c0_i32, %c0_i32_0 : i32, i32, i32
  }
  func.func @transform_15(%arg0: i32, %arg1: i32) -> (i32, i32, i32) {
    %c0_i32 = arith.constant 0 : i32
    %c0_i32_0 = arith.constant 0 : i32
    %c0_i32_1 = arith.constant 0 : i32
    return %arg1, %c0_i32, %c0_i32_0 : i32, i32, i32
  }
  func.func @transform_16(%arg0: i32, %arg1: i32) -> (i32, i32, i32) {
    %c0_i32 = arith.constant 0 : i32
    %c0_i32_0 = arith.constant 0 : i32
    %c0_i32_1 = arith.constant 0 : i32
    return %arg1, %c0_i32, %c0_i32_0 : i32, i32, i32
  }
  func.func @transform_17(%arg0: i32, %arg1: i32) -> (i32, i32, i32) {
    %c0_i32 = arith.constant 0 : i32
    %c0_i32_0 = arith.constant 0 : i32
    %c0_i32_1 = arith.constant 0 : i32
    return %arg1, %c0_i32, %c0_i32_0 : i32, i32, i32
  }
  func.func @transform_18(%arg0: i32, %arg1: i32) -> (i32, i32) {
    %c0_i32 = arith.constant 0 : i32
    %c0_i32_0 = arith.constant 0 : i32
    %c0_i32_1 = arith.constant 0 : i32
    return %c0_i32, %c0_i32_0 : i32, i32
  }
  func.func @transform_19(%arg0: i32, %arg1: i32) -> (i32, i32) {
    %c0_i32 = arith.constant 0 : i32
    %c0_i32_0 = arith.constant 0 : i32
    %c0_i32_1 = arith.constant 0 : i32
    return %c0_i32, %c0_i32_0 : i32, i32
  }
  func.func @transform_20(%arg0: i32, %arg1: i32) -> (i32, i32, i32) {
    %c0_i32 = arith.constant 0 : i32
    %c0_i32_0 = arith.constant 0 : i32
    %c0_i32_1 = arith.constant 0 : i32
    return %arg0, %c0_i32, %c0_i32_0 : i32, i32, i32
  }
}

</mosaic_0001>

<bundles_post_ra>
// kernel: tpu_custom_call.1
= control target key start
LH: loop header
LB: loop body
LE: loop exit
PB: predicated region body
PF: predicated region fallthrough
CT: control target
= control target key end

     0   :  { %s4748_s0 = inlined_call_operand.vmem [shape: f32[2,8,32], index: 0, kind: input, shape index: {}]   ;;  %s4749_s1 = inlined_call_operand.vmem [shape: f32[2,1,8], index: 1, kind: input, shape index: {}]   ;;  %s4750_s2 = inlined_call_operand.vmem [shape: f32[2,1,32], index: 2, kind: input, shape index: {}]   ;;  %s4751_s3 = inlined_call_operand.vmem [shape: f32[2,1,32], index: 3, kind: input, shape index: {}]   ;;  %s4752_s4 = inlined_call_operand.vmem [shape: f32[2,4,32,8], index: 4, kind: input, shape index: {}]   ;;  %s4753_s5 = inlined_call_operand.vmem [shape: f32[2,4,1,8], index: 5, kind: input, shape index: {}]   ;;  %s4754_s6 = inlined_call_operand.vmem [shape: f32[2,4,32,8], index: 6, kind: input, shape index: {}]   ;;  %s4755_s7 = inlined_call_operand.vmem [shape: f32[2,4,1,8], index: 7, kind: input, shape index: {}]   ;;  %s4756_s8 = inlined_call_operand.vmem [shape: f32[2,4,32,8], index: 8, kind: input, shape index: {}]   ;;  %s4757_s9 = inlined_call_operand.vmem [shape: f32[2,4,1,8], index: 9, kind: input, shape index: {}]   ;;  %s4758_s10 = inlined_call_operand.vmem [shape: f32[2,4,8,32], index: 10, kind: input, shape index: {}]   ;;  %s4759_s11 = inlined_call_operand.vmem [shape: f32[2,1,32], index: 11, kind: input, shape index: {}]   ;;  %s4760_s12 = inlined_call_operand.vmem [shape: f32[2,1,32], index: 12, kind: input, shape index: {}]   ;;  %s4761_s13 = inlined_call_operand.vmem [shape: f32[2,1,32], index: 13, kind: input, shape index: {}]   ;;  %s4762_s14 = inlined_call_operand.vmem [shape: f32[2,32,64], index: 14, kind: input, shape index: {}]   ;;  %s4763_s15 = inlined_call_operand.vmem [shape: f32[2,1,64], index: 15, kind: input, shape index: {}]   ;;  %s4764_s16 = inlined_call_operand.vmem [shape: f32[2,64,32], index: 16, kind: input, shape index: {}]   ;;  %s4765_s17 = inlined_call_operand.vmem [shape: f32[2,1,32], index: 17, kind: input, shape index: {}]   ;;  %s4766_s18 = inlined_call_operand.vmem [shape: f32[1,32], index: 18, kind: input, shape index: {}]   ;;  %s4767_s19 = inlined_call_operand.vmem [shape: f32[1,32], index: 19, kind: input, shape index: {}]   ;;  %s4768_s20 = inlined_call_operand.hbm [shape: f32[2,8,32], index: 20, kind: output, shape index: {}]  }
   0x1   :  { %4786 = sst [smem:[#allocation21_spill]] %s4748_s0 }
   0x2   :  { %4787 = sst [smem:[#allocation22_spill]] %s4749_s1 }
   0x3   :  { %4788 = sst [smem:[#allocation23_spill]] %s4750_s2 }
   0x4   :  { %4789 = sst [smem:[#allocation24_spill]] %s4751_s3 }
   0x5   :  { %4790 = sst [smem:[#allocation25_spill]] %s4752_s4 }
   0x6   :  { %4791 = sst [smem:[#allocation26_spill]] %s4753_s5 }
   0x7   :  { %4792 = sst [smem:[#allocation27_spill]] %s4754_s6 }
   0x8   :  { %4793 = sst [smem:[#allocation28_spill]] %s4755_s7 }
   0x9   :  { %4794 = sst [smem:[#allocation29_spill]] %s4756_s8 }
   0xa   :  { %4795 = sst [smem:[#allocation30_spill]] %s4757_s9 }
   0xb   :  { %4796 = sst [smem:[#allocation31_spill]] %s4758_s10 }
   0xc   :  { %4797 = sst [smem:[#allocation32_spill]] %s4759_s11 }
   0xd   :  { %4798 = sst [smem:[#allocation33_spill]] %s4760_s12 }
   0xe   :  { %4799 = sst [smem:[#allocation34_spill]] %s4762_s14 }
   0xf   :  { %4800 = sst [smem:[#allocation35_spill]] %s4763_s15 }
  0x10   :  { %4801 = sst [smem:[#allocation36_spill]] %s4764_s16 }
  0x11   :  { %4802 = sst [smem:[#allocation37_spill]] %s4765_s17 }
  0x12   :  { %4803 = sst [smem:[#allocation38_spill]] %s4766_s18 }
  0x13   :  { %4804 = sst [smem:[#allocation39_spill]] %s4767_s19 }
  0x14   :  { %4805 = sst [smem:[#allocation40_spill]] %s4768_s20 }
  0x15   :  { %25 = vsyncpa [#allocation4], 0 }
  0x16   :  { %27 = vsyncpa [#allocation4 + $0x1], 0  ;;  %s4226_s1 = smov 0   ;;  %s4228_s22 = smov 0  }
  0x17   :  { %s4230_s23 = smov 0   ;;  %s4232_s24 = smov 0  }
  0x18   :  { %s4234_s2 = smov 0   ;;  %s4236_s25 = smov 0  }
  0x19   :  { %s4238_s3 = smov 0   ;;  %s4240_s26 = smov 0  }
  0x1a LB: > { %4806 = sst [smem:[#allocation6_spill]] %s4087_s1  ;;  %s3423_s27 = sadd.s32 4294967295, %s4115_s26   ;;  %s4115_s26 = sphi %s4240_s26, %s33_s26   ;;  %s4111_s3 = sphi %s4238_s3, %s4872_s3   ;;  %s4107_s25 = sphi %s4236_s25, %s4871_s25   ;;  %s4103_s2 = sphi %s4234_s2, %s4870_s2   ;;  %s4099_s24 = sphi %s4232_s24, %s4869_s24   ;;  %s4095_s23 = sphi %s4230_s23, %s4868_s23   ;;  %s4091_s22 = sphi %s4228_s22, %s4867_s22   ;;  %s4087_s1 = sphi %s4226_s1, %s4866_s1  }
  0x1b   : > { %4807 = sst [smem:[#allocation7_spill]] %s4091_s22  ;;  %s3424_s28 = sadd.s32 4294967294, %s4115_s26  }
  0x1c   : > { %4808 = sst [smem:[#allocation8_spill]] %s4095_s23  ;;  %s42_s4 = sadd.s32 1, %s4107_s25 }
  0x1d   : > { %4809 = sst [smem:[#allocation9_spill]] %s4099_s24  ;;  %p43_p0 = scmp.ge.s32.totalorder %s42_s4, 2 }
  0x1e   : > { %4810 = sst [smem:[#allocation10_spill]] %s4103_s2  ;;  %s45_s29 = sadd.s32 1, %s4111_s3 }
  0x1f   : > { %4811 = sst [smem:[#allocation11_spill]] %s4107_s25  ;;  %p572_p1 = scmp.ne.s32.totalorder %s4095_s23, %s4091_s22 }
  0x20   : > { %4812 = sst [smem:[#allocation12_spill]] %s4111_s3  ;;  %p573_p2 = scmp.eq.s32.totalorder %s3423_s27, 3 }
  0x21   : > { %4813 = sst [smem:[#allocation13_spill]] %s4115_s26  ;;  %s4874_s4 = smov (%p43_p0, %s42_s4), 0 }
  0x22   : > { %4814 = sst [smem:[#allocation14_spill]] %s4874_s4  ;;  %s4876_s29 = smov (!%p43_p0, %s45_s29), %s4111_s3 }
  0x23   : > { %p4275_p3 = por %p573_p2, %p572_p1  ;;  %p578_p4 = scmp.ne.s32.totalorder %s4091_s22, %s4087_s1 }
  0x24   : > { %p47_p5 = scmp.ge.s32.totalorder %s4876_s29, 2  ;;  %p579_p6 = scmp.eq.s32.totalorder %s3424_s28, 3 }
  0x25   : > { %s4815_s30 = scalar_select %p4275_p3, 1, 0 }
  0x26   : > { %p3427_p7 = scmp.ge.s32.totalorder %s4115_s26, 1  ;;  %p727_p8 = scmp.lt.s32.totalorder %s4115_s26, 5 }
  0x27   : > { %4816 = sst [smem:[#allocation15_spill]] %s4815_s30  ;;  %s4878_s29 = smov (%p47_p5, %s4876_s29), 0 }
  0x28   : > { %4817 = sst [smem:[#allocation16_spill]] %s4878_s29  ;;  %p4285_p9 = por %p579_p6, %p578_p4 }
  0x29   : > { %p728_p10 = pnand %p3427_p7, %p727_p8  ;;  %s559_s21 = ssub.s32 %s4111_s3, %s4878_s29 }
  0x2a   : > { %s4818_s0 = scalar_select %p4285_p9, 1, 0 }
  0x2b   : > { %s562_s27 = sadd.s32 1, %s4095_s23  ;;  %p560_p11 = scmp.eq.s32.totalorder %s559_s21, 0 }
  0x2c   : > { %4819 = sst [smem:[#allocation17_spill]] %s4818_s0  ;;  %731 = sbr.rel (%p728_p10) target bundleno = 2725 (0xaa5), region = 100 }
  0x2d   : > { %s4293_s4 = scalar_select %p560_p11, %s4095_s23, %s562_s27  }
  0x2f   : > { %4820 = sst [smem:[#allocation18_spill]] %s4293_s4 }
  0x33   : > { %s4773_s28 = sand.u32 1, %s4091_s22   ;;  %p850_p12 = scmp.lt.s32.totalorder %s4103_s2, 1 }
  0x34   : > { %s4299_s25 = sshll.u32 %s4773_s28, 3  ;;  %p857_p13 = scmp.lt.s32.totalorder %s4099_s24, 1 }
  0x35   : > { %s4303_s0 = scalar_select %p850_p12, %s4103_s2, 1 }
  0x36   : > { %s4306_s21 = scalar_select %p857_p13, %s4099_s24, 1 }
  0x37   : > { %4821 = sst [smem:[#allocation19_spill]] %s4303_s0  ;;  %s3429_s27 = sshll.u32 %s4303_s0, 3 }
  0x38   : > { %s4823_s26 = sld [smem:[#allocation21_spill]]  ;;  %s3503_s15 = sshll.u32 %s4306_s21, 7 }
  0x39   : > { %s4826_s29 = sld [smem:[#allocation25_spill]]  ;;  %s3432_s1 = sshll.u32 %s4306_s21, 2 }
  0x3a   : > { %s4827_s5 = sld [smem:[#allocation26_spill]]  ;;  %s4828_s6 = sld [smem:[#allocation27_spill]] }
  0x3b   : > { %s4829_s7 = sld [smem:[#allocation28_spill]]  ;;  %s4830_s8 = sld [smem:[#allocation29_spill]] }
  0x3c   : > { %s4831_s9 = sld [smem:[#allocation30_spill]]  ;;  %s3506_s17 = sshll.u32 %s4306_s21, 5 }
  0x3d   : > { %s4832_s10 = sld [smem:[#allocation31_spill]]  ;;  %s903_s28 = scalar_lea.vmem %s4761_s13, %s4306_s21 }
  0x3e   : > { %s853_s20 = scalar_lea.vmem %s4823_s26, %s3429_s27  ;;  %s3508_s0 = sshll.u32 %s4306_s21, 6 }
  0x3f   : > { %s4328_s4 = scalar_lea.vmem %s4826_s29, %s3503_s15  ;;  %s4838_s24 = sld [smem:[#allocation37_spill]] }
  0x40   : > { %s4334_s22 = scalar_lea.vmem %s4827_s5, %s3432_s1  ;;  %s4339_s18 = scalar_lea.vmem %s4828_s6, %s3503_s15 }
  0x41   : > { %s4344_s27 = scalar_lea.vmem %s4829_s7, %s3432_s1  ;;  %s4349_s29 = scalar_lea.vmem %s4830_s8, %s3503_s15 }
  0x42   : > { %s4354_s26 = scalar_lea.vmem %s4831_s9, %s3432_s1  ;;  %s4836_s8 = sld [smem:[#allocation34_spill]] }
  0x43   : > { %s4360_s30 = scalar_lea.vmem %s4832_s10, %s3506_s17  ;;  %s4837_s10 = sld [smem:[#allocation35_spill]] }
  0x44   : > { %4833 = sst [smem:[#allocation20_spill]] %s4360_s30  ;;  %s4839_s15 = sld [smem:[#allocation36_spill]] }
  0x45   : > { %s919_s11 = scalar_lea.vmem %s4838_s24, %s4306_s21  ;;  %s849_s14 = scalar_lea.vmem [#allocation3], %s4299_s25 }
  0x46   : > { %s4840_s3 = sld [smem:[#allocation9_spill]] }
  0x48   : > { %s4377_s9 = scalar_lea.vmem %s4836_s8, %s3506_s17 }
  0x49   : > { %s911_s30 = scalar_lea.vmem %s4837_s10, %s4306_s21 }
  0x4a   : > { %s4391_s12 = scalar_lea.vmem %s4839_s15, %s3508_s0 }
  0x4c   : > { %p3445_p0 = scmp.ne.s32.totalorder %s4840_s3, 0 }
  0x4d   : > { %v924_v0 = vld [vmem:[%s853_s20] sm:$0xff] (!%p3445_p0)  ;;  %vm925_vm0 = vcmask (!%p3445_p0), 261120  }
  0x4e   : > { %923 = sbr.rel (%p3445_p0) target bundleno = 85 (0x55), region = 104  ;;  %926 = vst.msk [vmem:[#allocation2] sm:$0xff] (!%p3445_p0), %vm925_vm0, %v924_v0 }
  0x55 PF: > { %v4395_v1 = vld [vmem:[#allocation2] sm:$0xff]  ;;  %vm930_vm1 = vcmask 261120   ;;  %v968_v9 = vld [vmem:[%s4328_s4 + $0x8] sm:$0xff]  ;;  %v4117_v13 = vmov 0.0|0.0   ;;  %v969_v15 = vld [vmem:[%s4328_s4 + $0x10] sm:$0xff]  ;;  %vm4118_vm2 = vmmov 0  }
  0x56   : > { %v931_v2 = vsel %vm930_vm1, %v4395_v1, 0.0  ;;  %v967_v8 = vld [vmem:[%s4328_s4] sm:$0xff]  ;;  %v972_v12 = vld [vmem:[%s4328_s4 + $0x28] sm:$0xff]  ;;  %3829 = vmatprep.subr.bf16.mxu0 %v4117_v13  ;;  %3835 = vmatprep.subr.bf16.mxu1 %v4117_v13  ;;  %v970_v16 = vld [vmem:[%s4328_s4 + $0x18] sm:$0xff]  ;;  %v4119_v21 = vmov 0.0   ;;  %s4841_s17 = sld [smem:[#allocation23_spill]] }
  0x57   : > { %932 = vadd.xlane.f32.xlu0 %v931_v2  ;;  %v971_v10 = vld [vmem:[%s4328_s4 + $0x20] sm:$0xff]  ;;  %v3830_v11 = vpack.c.bf16 %v968_v9, %v967_v8  ;;  %v973_v17 = vld [vmem:[%s4328_s4 + $0x30] sm:$0xff]  ;;  %v3833_v18 = vpack.c.bf16 %v970_v16, %v969_v15  ;;  %v974_v19 = vld [vmem:[%s4328_s4 + $0x38] sm:$0xff]  ;;  %3615 = vmatprep.mubr.msk.f32.mxu0 %vm4118_vm2, %v4119_v21  ;;  %s4843_s15 = sld [smem:[#allocation24_spill]]  ;;  %vm1953_vm5 = vcmask 64512   ;;  %s4848_s23 = sld [smem:[#allocation20_spill]] }
  0x58   : > { %v3836_v14 = vpack.c.bf16 %v972_v12, %v971_v10  ;;  %v3839_v20 = vpack.c.bf16 %v974_v19, %v973_v17  ;;  %3626 = vmatprep.mubr.msk.f32.mxu1 %vm4118_vm2, %v4119_v21  ;;  %v975_v31 = vld [vmem:[%s4328_s4 + $0x40] sm:$0xff]  ;;  %v976_v33 = vld [vmem:[%s4328_s4 + $0x48] sm:$0xff]  ;;  %v977_v41 = vld [vmem:[%s4328_s4 + $0x50] sm:$0xff]  ;;  %s4849_s2 = sld [smem:[#allocation32_spill]]  ;;  %s4851_s6 = sld [smem:[#allocation33_spill]]  ;;  %vm3042_vm8 = vcmask 523264  }
  0x59   : > { %3831 = vmatpush3.bf16.msra.mxu0 %v3830_v11  ;;  %v979_v34 = vld [vmem:[%s4328_s4 + $0x60] sm:$0xff]  ;;  %v980_v35 = vld [vmem:[%s4328_s4 + $0x68] sm:$0xff]  ;;  %v3842_v39 = vpack.c.bf16 %v976_v33, %v975_v31  ;;  %v978_v43 = vld [vmem:[%s4328_s4 + $0x58] sm:$0xff] }
  0x5a   : > { %3837 = vmatpush3.bf16.msra.mxu1 %v3836_v14  ;;  %3832 = vmatprep.subr.bf16.mxu0 %v4117_v13  ;;  %v3848_v40 = vpack.c.bf16 %v980_v35, %v979_v34  ;;  %v981_v44 = vld [vmem:[%s4328_s4 + $0x70] sm:$0xff]  ;;  %v982_v45 = vld [vmem:[%s4328_s4 + $0x78] sm:$0xff]  ;;  %v3845_v46 = vpack.c.bf16 %v978_v43, %v977_v41  ;;  %v1298_v48 = vld [vmem:[%s4339_s18] sm:$0xff]  ;;  %s4845_s4 = sld [smem:[#allocation19_spill]] }
  0x5b   : > { %3838 = vmatprep.subr.bf16.mxu1 %v4117_v13  ;;  %v3851_v47 = vpack.c.bf16 %v982_v45, %v981_v44  ;;  %v1299_v49 = vld [vmem:[%s4339_s18 + $0x8] sm:$0xff]  ;;  %v1302_v50 = vld [vmem:[%s4339_s18 + $0x20] sm:$0xff]  ;;  %v1300_v54 = vld [vmem:[%s4339_s18 + $0x10] sm:$0xff] }
  0x5c   : > { %s4842_s20 = scalar_lea.vmem %s4841_s17, %s4306_s21  ;;  %v1303_v51 = vld [vmem:[%s4339_s18 + $0x28] sm:$0xff]  ;;  %v3854_v52 = vpack.c.bf16 %v1299_v49, %v1298_v48  ;;  %v1301_v55 = vld [vmem:[%s4339_s18 + $0x18] sm:$0xff]  ;;  %v1304_v56 = vld [vmem:[%s4339_s18 + $0x30] sm:$0xff] }
  0x5d   : > { %3834 = vmatpush3.bf16.msra.mxu0 %v3833_v18  ;;  %v3446_v30 = vld [vmem:[%s4842_s20] ss:$0 sm:$0xff]  ;;  %s4844_s1 = scalar_lea.vmem %s4843_s15, %s4306_s21  ;;  %v3860_v53 = vpack.c.bf16 %v1303_v51, %v1302_v50  ;;  %v1305_v57 = vld [vmem:[%s4339_s18 + $0x38] sm:$0xff]  ;;  %v3857_v58 = vpack.c.bf16 %v1301_v55, %v1300_v54  ;;  %v1307_v61 = vld [vmem:[%s4339_s18 + $0x48] sm:$0xff] }
  0x5e   : > { %3840 = vmatpush3.bf16.msra.mxu1 %v3839_v20  ;;  %3841 = vmatprep.subr.bf16.mxu0 %v4117_v13  ;;  %v3447_v37 = vld [vmem:[%s4844_s1] ss:$0 sm:$0xff]  ;;  %v3863_v59 = vpack.c.bf16 %v1305_v57, %v1304_v56  ;;  %v1311_v63 = vld [vmem:[%s4339_s18 + $0x68] sm:$0xff]  ;;  %v1624_v16 = vld [vmem:[%s4349_s29 + $0x10] sm:$0xff]  ;;  %s4850_s5 = scalar_lea.vmem %s4849_s2, %s4306_s21  ;;  %s4852_s7 = scalar_lea.vmem %s4851_s6, %s4306_s21 }
  0x5f   : > { %3847 = vmatprep.subr.bf16.mxu1 %v4117_v13  ;;  %v1306_v60 = vld [vmem:[%s4339_s18 + $0x40] sm:$0xff]  ;;  %v1623_v10 = vld [vmem:[%s4349_s29 + $0x8] sm:$0xff]  ;;  %v1625_v17 = vld [vmem:[%s4349_s29 + $0x18] sm:$0xff] }
  0x60   : > { %v1310_v62 = vld [vmem:[%s4339_s18 + $0x60] sm:$0xff]  ;;  %v3866_v0 = vpack.c.bf16 %v1307_v61, %v1306_v60  ;;  %v1627_v12 = vld [vmem:[%s4349_s29 + $0x28] sm:$0xff]  ;;  %v1628_v18 = vld [vmem:[%s4349_s29 + $0x30] sm:$0xff]  ;;  %v3881_v20 = vpack.c.bf16 %v1625_v17, %v1624_v16 }
  0x61   : > { %v3872_v2 = vpack.c.bf16 %v1311_v63, %v1310_v62  ;;  %v1622_v9 = vld [vmem:[%s4349_s29] sm:$0xff]  ;;  %v1629_v19 = vld [vmem:[%s4349_s29 + $0x38] sm:$0xff]  ;;  %v1636_v31 = vld [vmem:[%s4349_s29 + $0x70] sm:$0xff] }
  0x62   : > { %v1626_v11 = vld [vmem:[%s4349_s29 + $0x20] sm:$0xff]  ;;  %v3878_v14 = vpack.c.bf16 %v1623_v10, %v1622_v9 }
  0x63   : > { %v3884_v15 = vpack.c.bf16 %v1627_v12, %v1626_v11  ;;  %v3448_v44 = vld [vmem:[%s4334_s22] ss:$0 sm:$0xff]  ;;  %v3449_v48 = vld [vmem:[%s4334_s22 + $0x1] ss:$0 sm:$0xff]  ;;  %v3450_v55 = vld [vmem:[%s4334_s22 + $0x2] ss:$0 sm:$0xff] }
  0x64   : > { %v3451_v56 = vld [vmem:[%s4334_s22 + $0x3] ss:$0 sm:$0xff]  ;;  %v3465_v9 = vld [vmem:[%s4354_s26 + $0x1] ss:$0 sm:$0xff] }
  0xe4   : > { %v933_v3 = vpop.xlane.xlu0 %932 }
  0xe5   : > { %v935_v4 = vmul.f32 0.03125, %v933_v3  ;;  %v1308_v3 = vld [vmem:[%s4339_s18 + $0x50] sm:$0xff] }
  0xe7   : > { %v936_v5 = vsub.f32 %v4395_v1, %v935_v4  ;;  %v1309_v4 = vld [vmem:[%s4339_s18 + $0x58] sm:$0xff] }
  0xe9   : > { %v937_v6 = vmul.f32 %v936_v5, %v936_v5  ;;  %v956_v32 = vmul.f32 %v3446_v30, %v936_v5  ;;  %v1312_v5 = vld [vmem:[%s4339_s18 + $0x70] sm:$0xff]  ;;  %v1633_v30 = vld [vmem:[%s4349_s29 + $0x58] sm:$0xff] }
  0xeb   : > { %v938_v7 = vsel %vm930_vm1, %v937_v6, 0.0  ;;  %v1313_v6 = vld [vmem:[%s4339_s18 + $0x78] sm:$0xff] }
  0xec   : > { %939 = vadd.xlane.f32.xlu0 %v938_v7  ;;  %v3869_v7 = vpack.c.bf16 %v1309_v4, %v1308_v3  ;;  %v3875_v8 = vpack.c.bf16 %v1313_v6, %v1312_v5 }
 0x179   : > { %v940_v22 = vpop.xlane.xlu0 %939 }
 0x17a   : > { %v942_v23 = vmul.f32 0.032258064, %v940_v22  ;;  %v3887_v22 = vpack.c.bf16 %v1629_v19, %v1628_v18 }
 0x17c   : > { %3993 = vrsqrt.f32 %v942_v23  ;;  %vm945_vm3 = vcmp.eq.f32.partialorder %v942_v23, inf  ;;  %v948_v26 = vand.u32 2147483648, %v942_v23  ;;  %vm947_vm4 = vcmp.eq.f32.partialorder %v942_v23, 0.0 }
 0x186   : > { %v3994_v24 = vpop.eup %3993 }
 0x187   : > { %v944_v25 = vmul.f32 %v3994_v24, %v942_v23  ;;  %v1631_v24 = vld [vmem:[%s4349_s29 + $0x48] sm:$0xff] }
 0x189   : > { %v946_v27 = vsel %vm945_vm3, %v942_v23, %v944_v25  ;;  %v1630_v23 = vld [vmem:[%s4349_s29 + $0x40] sm:$0xff] }
 0x18a   : > { %v949_v28 = vsel %vm947_vm4, %v948_v26, %v946_v27  ;;  %v1634_v25 = vld [vmem:[%s4349_s29 + $0x60] sm:$0xff]  ;;  %v1635_v26 = vld [vmem:[%s4349_s29 + $0x68] sm:$0xff]  ;;  %v3890_v27 = vpack.c.bf16 %v1631_v24, %v1630_v23 }
 0x18b   : > { %v957_v29 = vadd.f32 1e-06, %v949_v28  ;;  %v3896_v28 = vpack.c.bf16 %v1635_v26, %v1634_v25 }
 0x18d   : > { %3995 = vrcp.f32 %v957_v29  ;;  %v1632_v29 = vld [vmem:[%s4349_s29 + $0x50] sm:$0xff] }
 0x18e   : > { %v3893_v33 = vpack.c.bf16 %v1633_v30, %v1632_v29 }
 0x197   : > { %v3996_v36 = vpop.eup %3995 }
 0x198   : > { %v959_v38 = vmul.f32 %v3996_v36, %v956_v32  ;;  %v1637_v32 = vld [vmem:[%s4349_s29 + $0x78] sm:$0xff] }
 0x199   : > { %v3899_v34 = vpack.c.bf16 %v1637_v32, %v1636_v31 }
 0x19a   : > { %v4434_v42 = vadd.f32 %v3447_v37, %v959_v38 }
 0x19c   : > { %3616 = vmatmul.mubr.msk.f32.vlgmr.msra.gmra.mrb[0].mxu0 %vm930_vm1, %v4434_v42  ;;  %3627 = vmatmul.mubr.msk.f32.vlgmr.msra.gmra.mrb[0].mxu1 %vm930_vm1, %v4434_v42 }
 0x19d   : > { %3843 = vmatpush3.bf16.msra.mxu0 %v3842_v39  ;;  %3849 = vmatpush3.bf16.msra.mxu1 %v3848_v40 }
 0x19e   : > { %3844 = vmatprep.subr.bf16.mxu0 %v4117_v13  ;;  %3850 = vmatprep.subr.bf16.mxu1 %v4117_v13 }
 0x19f   : > { %3637 = vmatprep.mubr.msk.f32.mxu0 %vm4118_vm2, %v4119_v21  ;;  %3648 = vmatprep.mubr.msk.f32.mxu1 %vm4118_vm2, %v4119_v21 }
 0x1a1   : > { %3846 = vmatpush3.bf16.msra.mxu0 %v3845_v46  ;;  %3852 = vmatpush3.bf16.msra.mxu1 %v3851_v47 }
 0x1a2   : > { %3853 = vmatprep.subr.bf16.mxu0 %v4117_v13  ;;  %3859 = vmatprep.subr.bf16.mxu1 %v4117_v13 }
 0x1a4   : > { %3638 = vmatmul.mubr.msk.f32.vlgmr.msra.gmra.mrb[2].mxu0 %vm930_vm1, %v4434_v42  ;;  %3649 = vmatmul.mubr.msk.f32.vlgmr.msra.gmra.mrb[2].mxu1 %vm930_vm1, %v4434_v42 }
 0x1a5   : > { %3855 = vmatpush3.bf16.msra.mxu0 %v3854_v52  ;;  %3861 = vmatpush3.bf16.msra.mxu1 %v3860_v53  ;;  %v3457_v52 = vld [vmem:[%s4344_s27 + $0x1] ss:$0 sm:$0xff] }
 0x1a6   : > { %3856 = vmatprep.subr.bf16.mxu0 %v4117_v13  ;;  %3862 = vmatprep.subr.bf16.mxu1 %v4117_v13 }
 0x1a7   : > { %3659 = vmatprep.mubr.msk.f32.mxu0 %vm4118_vm2, %v4119_v21  ;;  %3670 = vmatprep.mubr.msk.f32.mxu1 %vm4118_vm2, %v4119_v21 }
 0x1a9   : > { %3858 = vmatpush3.bf16.msra.mxu0 %v3857_v58  ;;  %3864 = vmatpush3.bf16.msra.mxu1 %v3863_v59  ;;  %v3458_v58 = vld [vmem:[%s4344_s27 + $0x2] ss:$0 sm:$0xff]  ;;  %v3459_v59 = vld [vmem:[%s4344_s27 + $0x3] ss:$0 sm:$0xff] }
 0x1aa   : > { %3865 = vmatprep.subr.bf16.mxu0 %v4117_v13  ;;  %3871 = vmatprep.subr.bf16.mxu1 %v4117_v13 }
 0x1ac   : > { %3660 = vmatmul.mubr.msk.f32.vlgmr.msra.gmra.mrb[4].mxu0 %vm930_vm1, %v4434_v42  ;;  %3671 = vmatmul.mubr.msk.f32.vlgmr.msra.gmra.mrb[4].mxu1 %vm930_vm1, %v4434_v42 }
 0x1ad   : > { %3867 = vmatpush3.bf16.msra.mxu0 %v3866_v0  ;;  %3873 = vmatpush3.bf16.msra.mxu1 %v3872_v2 }
 0x1ae   : > { %3868 = vmatprep.subr.bf16.mxu0 %v4117_v13  ;;  %3874 = vmatprep.subr.bf16.mxu1 %v4117_v13 }
 0x1af   : > { %3681 = vmatprep.mubr.msk.f32.mxu0 %vm4118_vm2, %v4119_v21  ;;  %3692 = vmatprep.mubr.msk.f32.mxu1 %vm4118_vm2, %v4119_v21 }
 0x1b1   : > { %3870 = vmatpush3.bf16.msra.mxu0 %v3869_v7  ;;  %3876 = vmatpush3.bf16.msra.mxu1 %v3875_v8  ;;  %v3464_v8 = vld [vmem:[%s4354_s26] ss:$0 sm:$0xff] }
 0x1b2   : > { %3877 = vmatprep.subr.bf16.mxu0 %v4117_v13  ;;  %3883 = vmatprep.subr.bf16.mxu1 %v4117_v13 }
 0x1b4   : > { %3682 = vmatmul.mubr.msk.f32.vlgmr.msra.gmra.mrb[6].mxu0 %vm930_vm1, %v4434_v42  ;;  %3693 = vmatmul.mubr.msk.f32.vlgmr.msra.gmra.mrb[6].mxu1 %vm930_vm1, %v4434_v42 }
 0x1b5   : > { %3879 = vmatpush3.bf16.msra.mxu0 %v3878_v14  ;;  %3885 = vmatpush3.bf16.msra.mxu1 %v3884_v15 }
 0x1b6   : > { %3880 = vmatprep.subr.bf16.mxu0 %v4117_v13  ;;  %3886 = vmatprep.subr.bf16.mxu1 %v4117_v13 }
 0x1b7   : > { %3703 = vmatprep.mubr.msk.f32.mxu0 %vm4118_vm2, %v4119_v21  ;;  %3714 = vmatprep.mubr.msk.f32.mxu1 %vm4118_vm2, %v4119_v21 }
 0x1b9   : > { %3882 = vmatpush3.bf16.msra.mxu0 %v3881_v20  ;;  %3888 = vmatpush3.bf16.msra.mxu1 %v3887_v22 }
 0x1ba   : > { %3889 = vmatprep.subr.bf16.mxu0 %v4117_v13  ;;  %3895 = vmatprep.subr.bf16.mxu1 %v4117_v13 }
 0x1bc   : > { %3704 = vmatmul.mubr.msk.f32.vlgmr.msra.gmra.mrb[8].mxu0 %vm930_vm1, %v4434_v42  ;;  %3715 = vmatmul.mubr.msk.f32.vlgmr.msra.gmra.mrb[8].mxu1 %vm930_vm1, %v4434_v42 }
 0x1bd   : > { %3891 = vmatpush3.bf16.msra.mxu0 %v3890_v27  ;;  %3897 = vmatpush3.bf16.msra.mxu1 %v3896_v28 }
 0x1be   : > { %3892 = vmatprep.subr.bf16.mxu0 %v4117_v13  ;;  %3898 = vmatprep.subr.bf16.mxu1 %v4117_v13 }
 0x1bf   : > { %3725 = vmatprep.mubr.msk.f32.mxu0 %vm4118_vm2, %v4119_v21  ;;  %3736 = vmatprep.mubr.msk.f32.mxu1 %vm4118_vm2, %v4119_v21 }
 0x1c1   : > { %3894 = vmatpush3.bf16.msra.mxu0 %v3893_v33  ;;  %3900 = vmatpush3.bf16.msra.mxu1 %v3899_v34 }
 0x1c2   : > { %3739 = vmatprep.subr.mxu0 %v4119_v21  ;;  %3754 = vmatprep.subr.mxu1 %v4119_v21 }
 0x1c4   : > { %3726 = vmatmul.mubr.msk.f32.vlgmr.msra.gmra.mrb[10].mxu0 %vm930_vm1, %v4434_v42  ;;  %3737 = vmatmul.mubr.msk.f32.vlgmr.msra.gmra.mrb[10].mxu1 %vm930_vm1, %v4434_v42  ;;  %v3456_v42 = vld [vmem:[%s4344_s27] ss:$0 sm:$0xff]  ;;  %s4846_s27 = sld [smem:[#allocation22_spill]] }
 0x1c5   : > { %3741 = vmatprep.mubr.msk.f32.mxu0 %vm4118_vm2, %v4119_v21  ;;  %3756 = vmatprep.mubr.msk.f32.mxu1 %vm4118_vm2, %v4119_v21 }
 0x1ca   : > { %s4847_s29 = scalar_lea.vmem %s4846_s27, %s4845_s4 }
 0x1cb   : > { %v3472_v22 = vld [vmem:[%s4847_s29] ss:$0 sm:$0xff] }
 0x26f   : > { %v1080_v35 = vpop.f32.mrb[0].mxu0  ;;  %v1150_v36 = vpop.f32.mrb[0].mxu1 }
 0x270   : > { %v3617_v37 = vpop.f32.mrb[1].mxu0  ;;  %v3628_v38 = vpop.f32.mrb[1].mxu1  ;;  %v1081_v45 = vadd.f32 %v3448_v44, %v1080_v35  ;;  %v1151_v54 = vadd.f32 %v3449_v48, %v1150_v36 }
 0x272   : > { %v1294_v53 = vmul.f32 0.35355338, %v1081_v45  ;;  %v1295_v60 = vmul.f32 0.35355338, %v1151_v54 }
 0x277   : > { %v1220_v39 = vpop.f32.mrb[2].mxu0  ;;  %v1290_v40 = vpop.f32.mrb[2].mxu1 }
 0x278   : > { %v3639_v41 = vpop.f32.mrb[3].mxu0  ;;  %v3650_v43 = vpop.f32.mrb[3].mxu1  ;;  %v1221_v61 = vadd.f32 %v3450_v55, %v1220_v39  ;;  %v1291_v62 = vadd.f32 %v3451_v56, %v1290_v40 }
 0x27a   : > { %v1296_v6 = vmul.f32 0.35355338, %v1221_v61  ;;  %v1297_v7 = vmul.f32 0.35355338, %v1291_v62 }
 0x27f   : > { %v1408_v46 = vpop.f32.mrb[4].mxu0  ;;  %v1478_v47 = vpop.f32.mrb[4].mxu1 }
 0x280   : > { %v1409_v49 = vadd.f32 %v3456_v42, %v1408_v46  ;;  %v3661_v50 = vpop.f32.mrb[5].mxu0  ;;  %v3672_v51 = vpop.f32.mrb[5].mxu1  ;;  %v1479_v57 = vadd.f32 %v3457_v52, %v1478_v47 }
 0x282   : > { %3740 = vmatpush3.xpose.msk.msra.mxu0 %vm1953_vm5, %v1409_v49 }
 0x283   : > { %3744 = vmatprep.subr.mxu0 %v4119_v21 }
 0x285   : > { %3742 = vmatmul.mubr.msk.f32.vlgmr.msra.gmra.mrb[12].mxu0 %vm1953_vm5, %v1294_v53 }
 0x286   : > { %3745 = vmatpush3.xpose.msk.msra.mxu0 %vm1953_vm5, %v1479_v57  ;;  %3746 = vmatprep.mubr.msk.f32.mxu0 %vm4118_vm2, %v4119_v21 }
 0x287   : > { %v1548_v63 = vpop.f32.mrb[6].mxu0  ;;  %v1618_v0 = vpop.f32.mrb[6].mxu1  ;;  %3749 = vmatprep.subr.mxu0 %v4119_v21 }
 0x288   : > { %v1549_v2 = vadd.f32 %v3458_v58, %v1548_v63  ;;  %v1619_v3 = vadd.f32 %v3459_v59, %v1618_v0  ;;  %v3683_v4 = vpop.f32.mrb[7].mxu0  ;;  %v3694_v5 = vpop.f32.mrb[7].mxu1  ;;  %v3466_v63 = vld [vmem:[%s4354_s26 + $0x2] ss:$0 sm:$0xff] }
 0x289   : > { %3747 = vmatmul.mubr.msk.f32.vlgmr.msra.gmra.mrb[14].mxu0 %vm1953_vm5, %v1295_v60  ;;  %v3467_v4 = vld [vmem:[%s4354_s26 + $0x3] ss:$0 sm:$0xff] }
 0x28a   : > { %3750 = vmatpush3.xpose.msk.msra.mxu0 %vm1953_vm5, %v1549_v2  ;;  %3755 = vmatpush3.xpose.msk.msra.mxu1 %vm1953_vm5, %v1619_v3 }
 0x28b   : > { %3751 = vmatprep.mubr.msk.f32.mxu0 %vm4118_vm2, %v4119_v21  ;;  %3759 = vmatprep.subr.mxu0 %v4119_v21 }
 0x28c   : > { %3764 = vmatprep.subr.mxu1 %v4119_v21 }
 0x28d   : > { %3752 = vmatmul.mubr.msk.f32.vlgmr.msra.gmra.mrb[16].mxu0 %vm1953_vm5, %v1296_v6  ;;  %3757 = vmatmul.mubr.msk.f32.vlgmr.msra.gmra.mrb[12].mxu1 %vm1953_vm5, %v1297_v7 }
 0x28e   : > { %3761 = vmatprep.mubr.msk.f32.mxu0 %vm4118_vm2, %v4119_v21  ;;  %3766 = vmatprep.mubr.msk.f32.mxu1 %vm4118_vm2, %v4119_v21 }
 0x28f   : > { %v1732_v10 = vpop.f32.mrb[8].mxu0  ;;  %v1802_v11 = vpop.f32.mrb[8].mxu1 }
 0x290   : > { %v1733_v12 = vadd.f32 %v3464_v8, %v1732_v10  ;;  %v1803_v14 = vadd.f32 %v3465_v9, %v1802_v11  ;;  %v3705_v15 = vpop.f32.mrb[9].mxu0  ;;  %v3716_v16 = vpop.f32.mrb[9].mxu1 }
 0x291   : > { %v2596_v15 = vld [vmem:[%s4848_s23 + $0x10] sm:$0xff] }
 0x292   : > { %3760 = vmatpush3.msra.mxu0 %v1733_v12  ;;  %3765 = vmatpush3.msra.mxu1 %v1803_v14  ;;  %v2594_v12 = vld [vmem:[%s4848_s23] sm:$0xff]  ;;  %v2595_v14 = vld [vmem:[%s4848_s23 + $0x8] sm:$0xff] }
 0x293   : > { %3769 = vmatprep.subr.mxu0 %v4119_v21  ;;  %3774 = vmatprep.subr.mxu1 %v4119_v21 }
 0x297   : > { %v4571_v17 = vpop.f32.mrb[10].mxu0  ;;  %v4573_v18 = vpop.f32.mrb[10].mxu1 }
 0x298   : > { %v3727_v19 = vpop.f32.mrb[11].mxu0  ;;  %v3738_v20 = vpop.f32.mrb[11].mxu1  ;;  %v1873_v3 = vadd.f32 %v3466_v63, %v4571_v17  ;;  %v1943_v7 = vadd.f32 %v3467_v4, %v4573_v18  ;;  %v2597_v18 = vld [vmem:[%s4848_s23 + $0x18] sm:$0xff] }
 0x358   : > { %v2026_v23 = vpop.f32.mrb[12].mxu0 }
 0x359   : > { %v2027_v24 = vadd.f32 %v3472_v22, %v2026_v23  ;;  %v3743_v25 = vpop.f32.mrb[13].mxu0 }
 0x35b   : > { %v2258_v26 = vsel %vm1953_vm5, %v2027_v24, -inf }
 0x35c   : > { %2259 = vmax.xlane.f32.xlu1 %v2258_v26  ;;  %v2102_v27 = vpop.f32.mrb[14].mxu0 }
 0x35d   : > { %v2103_v28 = vadd.f32 %v3472_v22, %v2102_v27  ;;  %v3748_v29 = vpop.f32.mrb[15].mxu0 }
 0x35f   : > { %v2261_v30 = vsel %vm1953_vm5, %v2103_v28, -inf }
 0x360   : > { %v2254_v31 = vpop.f32.mrb[12].mxu1  ;;  %2262 = vmax.xlane.f32.xlu1 %v2261_v30  ;;  %v2178_v32 = vpop.f32.mrb[16].mxu0 }
 0x361   : > { %v2255_v33 = vadd.f32 %v3472_v22, %v2254_v31  ;;  %v2179_v34 = vadd.f32 %v3472_v22, %v2178_v32  ;;  %v3753_v35 = vpop.f32.mrb[17].mxu0  ;;  %v3758_v36 = vpop.f32.mrb[13].mxu1 }
 0x363   : > { %v2267_v37 = vsel %vm1953_vm5, %v2255_v33, -inf  ;;  %v2264_v38 = vsel %vm1953_vm5, %v2179_v34, -inf }
 0x364   : > { %2268 = vmax.xlane.f32.xlu1 %v2267_v37  ;;  %2265 = vmax.xlane.f32.xlu0 %v2264_v38 }
 0x3e9   : > { %v2260_v39 = vpop.xlane.xlu1 %2259 }
 0x3ea   : > { %v2270_v40 = vsub.f32 %v2027_v24, %v2260_v39  ;;  %v3489_v39 = vld [vmem:[%s4850_s5] ss:$0 sm:$0xff] }
 0x3ec   : > { %v2274_v41 = vmul.f32 1.442695, %v2270_v40 }
 0x3ed   : > { %v2263_v43 = vpop.xlane.xlu1 %2262 }
 0x3ee   : > { %3997 = vpow2.f32 %v2274_v41  ;;  %v2271_v44 = vsub.f32 %v2103_v28, %v2263_v43 }
 0x3f0   : > { %v2276_v42 = vmul.f32 1.442695, %v2271_v44 }
 0x3f1   : > { %v2269_v45 = vpop.xlane.xlu1 %2268  ;;  %v2266_v46 = vpop.xlane.xlu0 %2265 }
 0x3f2   : > { %3999 = vpow2.f32 %v2276_v42  ;;  %v2273_v47 = vsub.f32 %v2255_v33, %v2269_v45  ;;  %v2272_v48 = vsub.f32 %v2179_v34, %v2266_v46 }
 0x3f4   : > { %v2280_v49 = vmul.f32 1.442695, %v2273_v47  ;;  %v2278_v50 = vmul.f32 1.442695, %v2272_v48 }
 0x3f6   : > { %4001 = vpow2.f32 %v2280_v49  ;;  %v2942_v49 = vld [vmem:[%s4377_s9] sm:$0xff] }
 0x3f7   : > { %4003 = vpow2.f32 %v2278_v50  ;;  %v2943_v50 = vld [vmem:[%s4377_s9 + $0x8] sm:$0xff] }
 0x3f8   : > { %v3998_v51 = vpop.eup %3997 }
 0x3f9   : > { %v2282_v52 = vsel %vm1953_vm5, %v3998_v51, 0.0 }
 0x3fa   : > { %2283 = vadd.xlane.f32.xlu0 %v2282_v52  ;;  %v2945_v52 = vld [vmem:[%s4377_s9 + $0x18] sm:$0xff] }
 0x3fc   : > { %v4000_v53 = vpop.eup %3999 }
 0x3fd   : > { %v2285_v54 = vsel %vm1953_vm5, %v4000_v53, 0.0 }
 0x3fe   : > { %2286 = vadd.xlane.f32.xlu1 %v2285_v54  ;;  %v3027_v54 = vld [vmem:[%s4391_s12] sm:$0xff] }
 0x400   : > { %v4002_v55 = vpop.eup %4001 }
 0x401   : > { %v4004_v56 = vpop.eup %4003  ;;  %v2291_v57 = vsel %vm1953_vm5, %v4002_v55, 0.0 }
 0x402   : > { %2292 = vadd.xlane.f32.xlu1 %v2291_v57  ;;  %v2288_v58 = vsel %vm1953_vm5, %v4004_v56, 0.0 }
 0x403   : > { %2289 = vadd.xlane.f32.xlu0 %v2288_v58  ;;  %v3030_v58 = vld [vmem:[%s4391_s12 + $0x18] sm:$0xff] }
 0x487   : > { %v2284_v59 = vpop.xlane.xlu0 %2283 }
 0x488   : > { %4005 = vrcp.f32 %v2284_v59 }
 0x48b   : > { %v2287_v60 = vpop.xlane.xlu1 %2286 }
 0x48c   : > { %4007 = vrcp.f32 %v2287_v60  ;;  %v3031_v60 = vld [vmem:[%s4391_s12 + $0x20] sm:$0xff] }
 0x48f   : > { %v2293_v61 = vpop.xlane.xlu1 %2292 }
 0x490   : > { %4009 = vrcp.f32 %v2293_v61  ;;  %v2290_v62 = vpop.xlane.xlu0 %2289  ;;  %v3032_v61 = vld [vmem:[%s4391_s12 + $0x28] sm:$0xff] }
 0x491   : > { %4011 = vrcp.f32 %v2290_v62  ;;  %v3914_v62 = vpack.c.bf16 %v3032_v61, %v3031_v60 }
 0x492   : > { %v4006_v0 = vpop.eup %4005 }
 0x493   : > { %v2298_v2 = vmul.f32 %v4006_v0, %v3998_v51  ;;  %v3902_v51 = vpack.c.bf16 %v2943_v50, %v2942_v49 }
 0x495   : > { %3762 = vmatmul.mubr.msk.f32.vlgmr.msra.gmra.mrb[18].mxu0 %vm1953_vm5, %v2298_v2 }
 0x496   : > { %v4008_v5 = vpop.eup %4007  ;;  %3770 = vmatpush3.msra.mxu0 %v1873_v3  ;;  %3771 = vmatprep.mubr.msk.f32.mxu0 %vm4118_vm2, %v4119_v21 }
 0x497   : > { %v2299_v6 = vmul.f32 %v4008_v5, %v4000_v53  ;;  %3779 = vmatprep.subr.mxu0 %v4119_v21 }
 0x499   : > { %3767 = vmatmul.mubr.msk.f32.vlgmr.msra.gmra.mrb[14].mxu1 %vm1953_vm5, %v2299_v6 }
 0x49a   : > { %v4010_v8 = vpop.eup %4009  ;;  %3775 = vmatpush3.msra.mxu1 %v1943_v7  ;;  %3776 = vmatprep.mubr.msk.f32.mxu1 %vm4118_vm2, %v4119_v21 }
 0x49b   : > { %v4012_v9 = vpop.eup %4011  ;;  %v2301_v10 = vmul.f32 %v4010_v8, %v4002_v55  ;;  %3784 = vmatprep.subr.mxu1 %v4119_v21  ;;  %v3028_v55 = vld [vmem:[%s4391_s12 + $0x8] sm:$0xff] }
 0x49c   : > { %v2300_v11 = vmul.f32 %v4012_v9, %v4004_v56  ;;  %v3029_v56 = vld [vmem:[%s4391_s12 + $0x10] sm:$0xff]  ;;  %v3908_v57 = vpack.c.bf16 %v3028_v55, %v3027_v54 }
 0x49d   : > { %3777 = vmatmul.mubr.msk.f32.vlgmr.msra.gmra.mrb[16].mxu1 %vm1953_vm5, %v2301_v10  ;;  %v3911_v59 = vpack.c.bf16 %v3030_v58, %v3029_v56  ;;  %v3491_v10 = vld [vmem:[%s903_s28] ss:$0 sm:$0xff] }
 0x49e   : > { %3772 = vmatmul.mubr.msk.f32.vlgmr.msra.gmra.mrb[20].mxu0 %vm1953_vm5, %v2300_v11  ;;  %3786 = vmatprep.mubr.msk.f32.mxu1 %vm4118_vm2, %v4119_v21 }
 0x49f   : > { %3781 = vmatprep.mubr.msk.f32.mxu0 %vm4118_vm2, %v4119_v21  ;;  %3780 = vmatpush3.msra.mxu0 %v2594_v12 }
 0x4a0   : > { %3789 = vmatprep.subr.mxu0 %v4119_v21  ;;  %3785 = vmatpush3.msra.mxu1 %v2595_v14  ;;  %v3033_v14 = vld [vmem:[%s4391_s12 + $0x30] sm:$0xff] }
 0x4a1   : > { %3794 = vmatprep.subr.mxu1 %v4119_v21 }
 0x568   : > { %v2371_v16 = vpop.f32.mrb[18].mxu0 }
 0x569   : > { %v3763_v17 = vpop.f32.mrb[19].mxu0  ;;  %3782 = vmatmul.mubr.msk.f32.vlgmr.msra.gmra.mrb[22].mxu0 %vm1953_vm5, %v2371_v16 }
 0x56a   : > { %3790 = vmatpush3.msra.mxu0 %v2596_v15  ;;  %3791 = vmatprep.mubr.msk.f32.mxu0 %vm4118_vm2, %v4119_v21  ;;  %v3034_v15 = vld [vmem:[%s4391_s12 + $0x38] sm:$0xff]  ;;  %v3492_v17 = vld [vmem:[%s911_s30] ss:$0 sm:$0xff]  ;;  %s4855_s12 = sld [smem:[#allocation9_spill]] }
 0x56b   : > { %3901 = vmatprep.subr.bf16.mxu0 %v4117_v13  ;;  %v3917_v16 = vpack.c.bf16 %v3034_v15, %v3033_v14 }
 0x56c   : > { %v2444_v19 = vpop.f32.mrb[14].mxu1 }
 0x56d   : > { %v3768_v20 = vpop.f32.mrb[15].mxu1  ;;  %3787 = vmatmul.mubr.msk.f32.vlgmr.msra.gmra.mrb[18].mxu1 %vm1953_vm5, %v2444_v19 }
 0x56e   : > { %3795 = vmatpush3.msra.mxu1 %v2597_v18  ;;  %3796 = vmatprep.mubr.msk.f32.mxu1 %vm4118_vm2, %v4119_v21 }
 0x56f   : > { %3907 = vmatprep.subr.bf16.mxu1 %v4117_v13 }
 0x570   : > { %v2590_v22 = vpop.f32.mrb[16].mxu1  ;;  %p3496_p1 = scmp.ne.s32.totalorder %s4855_s12, 1 }
 0x571   : > { %v2517_v23 = vpop.f32.mrb[20].mxu0  ;;  %v3778_v24 = vpop.f32.mrb[17].mxu1  ;;  %3797 = vmatmul.mubr.msk.f32.vlgmr.msra.gmra.mrb[20].mxu1 %vm1953_vm5, %v2590_v22  ;;  %s4856_s30 = sld [smem:[#allocation38_spill]] (!%p3496_p1)  ;;  %s4857_s4 = sld [smem:[#allocation39_spill]] (!%p3496_p1) }
 0x572   : > { %v3773_v25 = vpop.f32.mrb[21].mxu0  ;;  %3792 = vmatmul.mubr.msk.f32.vlgmr.msra.gmra.mrb[24].mxu0 %vm1953_vm5, %v2517_v23  ;;  %3826 = vmatprep.mubr.msk.f32.mxu1 %vm4118_vm2, %v4119_v21  ;;  %v3494_v23 = vld [vmem:[%s919_s11] ss:$0 sm:$0xff] }
 0x573   : > { %3807 = vmatprep.mubr.msk.f32.mxu0 %vm4118_vm2, %v4119_v21  ;;  %3903 = vmatpush3.bf16.msra.mxu0 %v3902_v51 }
 0x574   : > { %3904 = vmatprep.subr.bf16.mxu0 %v4117_v13  ;;  %3909 = vmatpush3.bf16.msra.mxu1 %v3908_v57 }
 0x575   : > { %3910 = vmatprep.subr.bf16.mxu1 %v4117_v13 }
 0x578   : > { %3912 = vmatpush3.bf16.msra.mxu1 %v3911_v59 }
 0x579   : > { %3913 = vmatprep.subr.bf16.mxu1 %v4117_v13 }
 0x57c   : > { %3915 = vmatpush3.bf16.msra.mxu1 %v3914_v62 }
 0x57d   : > { %3916 = vmatprep.subr.bf16.mxu1 %v4117_v13  ;;  %v3490_v13 = vld [vmem:[%s4852_s7] ss:$0 sm:$0xff] }
 0x580   : > { %3918 = vmatpush3.bf16.msra.mxu1 %v3917_v16 }
 0x63c   : > { %v2667_v26 = vpop.f32.mrb[22].mxu0 }
 0x63d   : > { %v3783_v27 = vpop.f32.mrb[23].mxu0  ;;  %v2890_v29 = vsel %vm930_vm1, %v2667_v26, 0.0 }
 0x640   : > { %v2740_v28 = vpop.f32.mrb[18].mxu1 }
 0x641   : > { %v2891_v30 = vsel %vm930_vm1, %v2740_v28, 0.0  ;;  %v3788_v31 = vpop.f32.mrb[19].mxu1 }
 0x642   : > { %v2892_v32 = vadd.f32 %v2891_v30, %v2890_v29 }
 0x644   : > { %v2886_v33 = vpop.f32.mrb[20].mxu1 }
 0x645   : > { %v2813_v34 = vpop.f32.mrb[24].mxu0  ;;  %v3798_v35 = vpop.f32.mrb[21].mxu1  ;;  %v2895_v21 = vsel %vm930_vm1, %v2886_v33, 0.0 }
 0x646   : > { %v2893_v36 = vsel %vm930_vm1, %v2813_v34, 0.0  ;;  %v3793_v37 = vpop.f32.mrb[25].mxu0 }
 0x647   : > { %v2894_v38 = vadd.f32 %v2893_v36, %v2892_v32 }
 0x649   : > { %v2896_v40 = vadd.f32 %v2895_v21, %v2894_v38 }
 0x64b   : > { %v2904_v41 = vadd.f32 %v3489_v39, %v2896_v40 }
 0x64d   : > { %v4636_v43 = vadd.f32 %v2904_v41, %v4395_v1  ;;  %v2944_v1 = vld [vmem:[%s4377_s9 + $0x10] sm:$0xff]  ;;  %v3497_v41 = vld [vmem:[%s4856_s30] ss:$0 sm:$0xff] (!%p3496_p1) }
 0x64e   : > { %v3905_v53 = vpack.c.bf16 %v2945_v52, %v2944_v1 }
 0x64f   : > { %v2908_v44 = vsel %vm930_vm1, %v4636_v43, 0.0 }
 0x650   : > { %2909 = vadd.xlane.f32.xlu0 %v2908_v44  ;;  %3906 = vmatpush3.bf16.msra.mxu0 %v3905_v53 }
 0x6dd   : > { %v2910_v42 = vpop.xlane.xlu0 %2909 }
 0x6de   : > { %v2911_v45 = vmul.f32 0.03125, %v2910_v42  ;;  %v3498_v42 = vld [vmem:[%s4857_s4] ss:$0 sm:$0xff] (!%p3496_p1) }
 0x6e0   : > { %v2912_v46 = vsub.f32 %v4636_v43, %v2911_v45 }
 0x6e2   : > { %v2913_v47 = vmul.f32 %v2912_v46, %v2912_v46  ;;  %v2931_v8 = vmul.f32 %v3490_v13, %v2912_v46 }
 0x6e4   : > { %v2914_v48 = vsel %vm930_vm1, %v2913_v47, 0.0 }
 0x6e5   : > { %2915 = vadd.xlane.f32.xlu1 %v2914_v48 }
 0x772   : > { %v2916_v63 = vpop.xlane.xlu1 %2915 }
 0x773   : > { %v2917_v0 = vmul.f32 0.032258064, %v2916_v63 }
 0x775   : > { %4013 = vrsqrt.f32 %v2917_v0  ;;  %vm2920_vm6 = vcmp.eq.f32.partialorder %v2917_v0, inf  ;;  %v2923_v4 = vand.u32 2147483648, %v2917_v0  ;;  %vm2922_vm7 = vcmp.eq.f32.partialorder %v2917_v0, 0.0 }
 0x77f   : > { %v4014_v2 = vpop.eup %4013 }
 0x780   : > { %v2919_v3 = vmul.f32 %v4014_v2, %v2917_v0 }
 0x782   : > { %v2921_v5 = vsel %vm2920_vm6, %v2917_v0, %v2919_v3 }
 0x783   : > { %v2924_v6 = vsel %vm2922_vm7, %v2923_v4, %v2921_v5 }
 0x784   : > { %v2932_v7 = vadd.f32 1e-06, %v2924_v6 }
 0x786   : > { %4015 = vrcp.f32 %v2932_v7 }
 0x790   : > { %v4016_v9 = vpop.eup %4015 }
 0x791   : > { %v2934_v11 = vmul.f32 %v4016_v9, %v2931_v8 }
 0x793   : > { %v2941_v12 = vadd.f32 %v3491_v10, %v2934_v11 }
 0x795   : > { %3808 = vmatmul.mubr.msk.f32.vlgmr.msra.gmra.mrb[26].mxu0 %vm930_vm1, %v2941_v12 }
 0x868   : > { %v3022_v18 = vpop.f32.mrb[26].mxu0 }
 0x869   : > { %v3023_v19 = vadd.f32 %v3492_v17, %v3022_v18  ;;  %v3809_v20 = vpop.f32.mrb[27].mxu0 }
 0x86b   : > { %v3026_v22 = vmax.f32 %v3023_v19, 0.0 }
 0x86d   : > { %3827 = vmatmul.mubr.msk.f32.vlgmr.msra.gmra.mrb[22].mxu1 %vm3042_vm8, %v3026_v22 }
 0x93f   : > { %3121 = sbr.rel (%p3496_p1) target bundleno = 2700 (0xa8c), region = 108 }
 0x940   : > { %v3112_v24 = vpop.f32.mrb[22].mxu1 }
 0x941   : > { %v3113_v25 = vadd.f32 %v3494_v23, %v3112_v24  ;;  %v3828_v26 = vpop.f32.mrb[23].mxu1 }
 0x943   : > { %v3116_v27 = vadd.f32 %v3113_v25, %v4636_v43 }
 0x945   : > { %3117 = vst.msk [vmem:[#allocation2] sm:$0xff] %vm930_vm1, %v3116_v27  ;;  %v3124_v28 = vsel (!%p3496_p1), %vm930_vm1, %v3116_v27, 0.0 }
 0x946   : > { %3125 = vadd.xlane.f32.xlu0 %v3124_v28 }
 0x9d3   : > { %v3126_v29 = vpop.xlane.xlu0 %3125 }
 0x9d4   : > { %v3127_v30 = vmul.f32 0.03125, %v3126_v29 }
 0x9d6   : > { %v3128_v31 = vsub.f32 %v3116_v27, %v3127_v30 }
 0x9d8   : > { %v3129_v32 = vmul.f32 %v3128_v31, %v3128_v31  ;;  %v3147_v43 = vmul.f32 %v3497_v41, %v3128_v31 }
 0x9da   : > { %v3130_v33 = vsel %vm930_vm1, %v3129_v32, 0.0 }
 0x9db   : > { %3131 = vadd.xlane.f32.xlu0 %v3130_v33 }
 0xa68   : > { %v3132_v34 = vpop.xlane.xlu0 %3131 }
 0xa69   : > { %v3133_v35 = vmul.f32 0.032258064, %v3132_v34 }
 0xa6b   : > { %4017 = vrsqrt.f32 %v3133_v35  ;;  %vm3136_vm9 = vcmp.eq.f32.partialorder %v3133_v35, inf  ;;  %v3139_v38 = vand.u32 2147483648, %v3133_v35  ;;  %vm3138_vm10 = vcmp.eq.f32.partialorder %v3133_v35, 0.0 }
 0xa75   : > { %v4018_v36 = vpop.eup %4017 }
 0xa76   : > { %v3135_v37 = vmul.f32 %v4018_v36, %v3133_v35 }
 0xa78   : > { %v3137_v21 = vsel %vm3136_vm9, %v3133_v35, %v3135_v37 }
 0xa79   : > { %v3140_v39 = vsel %vm3138_vm10, %v3139_v38, %v3137_v21 }
 0xa7a   : > { %v3148_v40 = vadd.f32 1e-06, %v3140_v39 }
 0xa7c   : > { %4019 = vrcp.f32 %v3148_v40 }
 0xa86   : > { %v4020_v44 = vpop.eup %4019 }
 0xa87   : > { %v3150_v45 = vmul.f32 %v4020_v44, %v3147_v43 }
 0xa89   : > { %v3157_v46 = vadd.f32 %v3498_v42, %v3150_v45 }
 0xa8b   : > { %3158 = vst.msk [vmem:[%s849_s14] sm:$0xff] %vm930_vm1, %v3157_v46 }
 0xa8c PF: > { %s4858_s22 = sld [smem:[#allocation10_spill]]  ;;  %s4859_s18 = sld [smem:[#allocation7_spill]] }
 0xa8d   : > { %s4861_s19 = sld [smem:[#allocation40_spill]]  ;;  %s3173_s5 = sshll.u32 %s849_s14, 4  ;;  %s3174_s5 = int_to_ptr.vmem [resolvable:$true] %s3173_s5 }
 0xa8e   : > { %s4021_s6 = scalar_lea.vmem %s3174_s5, 128  ;;  %s4120_s7 = smov [#allocation3]  }
 0xa8f   : > { %p4022_p2 = scmp.ne.s32.totalorder %s3174_s5, %s4021_s6  ;;  %s4025_s3 = sshll.u32 %s4120_s7, 4  ;;  %s4026_s3 = int_to_ptr.vmem [resolvable:$false] %s4025_s3 }
 0xa90   : > { %s4027_s8 = scalar_lea.vmem %s4026_s3, 256  ;;  %p4028_p6 = scmp.lt.s32.totalorder %s3174_s5, %s4026_s3 }
 0xa91   : > { %p4023_p4 = pnand %p4022_p2, %p4275_p3  ;;  %p4029_p7 = scmp.lt.s32.totalorder %s4027_s8, %s4021_s6 }
 0xa92   : > { %s3500_s29 = sshll.u32 %s4858_s22, 7  ;;  %s4862_s9 = sand.u32 1, %s4859_s18  }
 0xa93   : > { %s4697_s2 = scalar_lea.hbm %s4861_s19, %s3500_s29  ;;  %s3160_s16 = scalar_lea.sflag [#allocation4], %s4862_s9 }
 0xa94   : > { %p4024_p5 = pneg %p4023_p4  ;;  %p4030_p8 = por %p4029_p7, %p4028_p6 }
 0xa96   : > { %p4031_p10 = pnand %p4030_p8, %p4024_p5 }
 0xa98   : > { %4034 = shalt.err (!%p4031_p10)
}
 0xa99   : > { %s4035_s25 = scalar_lea.hbm %s4697_s2, 128  ;;  %s4039_s17 = scalar_lea.hbm %s4861_s19, 256 }
 0xa9a   : > { %p4036_p11 = scmp.ne.s32.totalorder %s4697_s2, %s4035_s25  ;;  %p4040_p0 = scmp.lt.u32.totalorder %s4697_s2, %s4861_s19 }
 0xa9b   : > { %p4041_p1 = scmp.lt.u32.totalorder %s4039_s17, %s4035_s25  ;;  %p4043_p4 = scmp.lt.u32.totalorder %s4035_s25, %s4697_s2 }
 0xa9c   : > { %p4037_p12 = pnand %p4036_p11, %p4275_p3 }
 0xa9d   : > { %p4042_p2 = por %p4041_p1, %p4040_p0 }
 0xa9e   : > { %p4038_p13 = pneg %p4037_p12 }
 0xa9f   : > { %p4044_p5 = por %p4043_p4, %p4042_p2 }
 0xaa1   : > { %p4045_p6 = pnand %p4044_p5, %p4038_p13 }
 0xaa3   : > { %4048 = shalt.err (!%p4045_p6)
}
 0xaa4   : > { %3919 = dma.vmem_to_hbm [thread:$0]  (%p4275_p3), %s3174_s5, 128, %s4697_s2, %s3160_s16  }
 0xaa5 PF: > { %s4863_s0 = sld [smem:[#allocation13_spill]]  ;;  %s4864_s24 = sld [smem:[#allocation6_spill]] }
 0xaab   : > { %p3925_p7 = scmp.ge.s32.totalorder %s4863_s0, 2  ;;  %s3185_s11 = sand.u32 1, %s4864_s24  }
 0xaac   : > { %s3186_s21 = scalar_lea.sflag [#allocation4], %s3185_s11 }
 0xaad   : > { %p3922_p8 = pnand %p3925_p7, %p4285_p9 }
 0xaaf   : > { %4082 = dma.done.wait (!%p3922_p8), %s3186_s21, 128  }
 0xab0   : > { %4084 = vsyncadd (!%p3922_p8), %s3186_s21, 4294967168  ;;  %s33_s26 = sadd.s32 1, %s4863_s0   ;;  %s4866_s1 = sld [smem:[#allocation7_spill]] }
 0xab1   : > { %p30_p10 = scmp.ge.s32.totalorder %s33_s26, 6   ;;  %s4867_s22 = sld [smem:[#allocation8_spill]] }
 0xab2   : > { %s4868_s23 = sld [smem:[#allocation18_spill]]  ;;  %s4869_s24 = sld [smem:[#allocation11_spill]] }
 0xab3   : > { %s4870_s2 = sld [smem:[#allocation12_spill]]  ;;  %s4871_s25 = sld [smem:[#allocation14_spill]] }
 0xab4   : > { %s4872_s3 = sld [smem:[#allocation16_spill]]  ;;  %32 = sbr.rel (!%p30_p10) target bundleno = 26 (0x1a), region = 194 }
 0xabb   :  { %3191 = vsyncpa [#allocation4], 1 }
 0xabc   :  { %3193 = vsyncpa [#allocation4 + $0x1], 1 }

</bundles_post_ra>
